<compile_context>
chip_gen: v7x
topology: tpu7x:2x2x1
jax: 0.10.0
libtpu: 0.0.40
codegen_flags: <defaults>
</compile_context>

<pallas_src>
import jax
import jax.numpy as jnp
from jax import lax
from jax.experimental import pallas as pl
from jax.experimental.pallas import tpu as pltpu

HIDDEN = 32        # hidden width of the synthetic net
LANE = 128         # vreg lane width
CHUNK_R = 64       # rows per register-resident chunk (64*128 f32 = 8 vregs)
TILE_R_MAX = 2048  # rows per grid step (x + out, double-buffered: ~4 MiB VMEM)


def _round_up(n, m):
    return -(-n // m) * m


def _pick_compute_dtype():
    """bf16 tanh path on v6e / v7x (bf16-native EUP); f32 elsewhere (v5e-)."""
    try:
        kind = jax.devices()[0].device_kind.lower()
    except Exception:
        return jnp.float32
    if any(tag in kind for tag in ("v6", "v7", "tpu7", "7x", "7e", "7p")):
        return jnp.bfloat16
    return jnp.float32


def _make_kernel(hidden, chunk_r, num_chunks, compute_dtype):
    cdt = compute_dtype

    def kernel(w1_ref, b1_ref, w2_ref, c_ref, scal_ref, x_ref, o_ref):
        """Fused net.value_and_grad + sqrt((1+dydx^2)/(2*g*y+v0^2)).

        w1_ref, b1_ref, w2_ref, c_ref : SMEM (HIDDEN,) f32, c = w1*w2
        scal_ref                      : SMEM (4,) f32 -> [b2, 2*g, v0^2, sum(c)]
        x_ref, o_ref                  : VMEM (TILE_R, 128) f32
        """
        b2 = scal_ref[0]
        two_g = scal_ref[1]
        v0sq = scal_ref[2]
        c_sum = scal_ref[3]

        # Inner loop over register-resident row chunks: x / y / s are 8 vregs
        # each, so the unrolled k-loop below keeps its accumulators in vregs
        # (no VMEM round-trip per hidden unit).
        @pl.loop(0, num_chunks)
        def _(ci):
            r0 = pl.multiple_of(ci * chunk_r, chunk_r)
            x = x_ref[pl.ds(r0, chunk_r), :]
            y = jnp.zeros((chunk_r, LANE), jnp.float32)
            s = jnp.zeros((chunk_r, LANE), jnp.float32)
            # Static (trace-time) loop over the hidden dim: one EUP tanh and a
            # few VPU ops per k on the whole (chunk_r, 128) chunk. Scalar math
            # stays in f32 sregs; the tanh runs in `cdt` (bf16 on v6e/v7x).
            for k in range(hidden):
                pre = w1_ref[k] * x + b1_ref[k]
                h = jnp.tanh(pre.astype(cdt)).astype(jnp.float32)
                y = y + w2_ref[k] * h
                s = s + c_ref[k] * (h * h)

            dydx = c_sum - s                   # = sum_k c_k*(1 - h_k^2)
            num = 1.0 + dydx * dydx
            den = two_g * (y + b2) + v0sq
            # sqrt(num/den) == num * rsqrt(num*den): a single EUP op, no divide.
            o_ref[pl.ds(r0, chunk_r), :] = (
                num * lax.rsqrt(num * den)).astype(o_ref.dtype)

    return kernel


def brachistochrone_forward(x, t, params, g, v0, compute_dtype=None):
    """Pallas wrapper matching Brachistochrone.forward(x, t).

    `t` is accepted (as in the PyTorch signature) but unused by forward.
    Returns a 1-D array of shape (x.size,), like the torch version.
    """
    del t  # unused in the reference forward
    if compute_dtype is None:
        compute_dtype = _pick_compute_dtype()

    w1, b1, w2, b2 = params
    w1 = w1.astype(jnp.float32)
    b1 = b1.astype(jnp.float32)
    w2 = w2.astype(jnp.float32)
    c = w1 * w2  # per-hidden-unit derivative coefficient, folded in the wrapper

    x_flat = x.reshape(-1).astype(jnp.float32)  # x.view(-1)
    n = x_flat.shape[0]

    # Row layout: pack elements into (rows, 128) lanes.
    sub = 16 if compute_dtype == jnp.bfloat16 else 8  # sublane alignment
    rows = -(-max(n, 1) // LANE)

    if rows <= CHUNK_R:
        # Tiny input: single tile == single chunk.
        chunk_r = _round_up(rows, sub)
        tile_r = chunk_r
    else:
        chunk_r = CHUNK_R
        n_chunks_total = -(-rows // CHUNK_R)
        # Aim for >= 2 grid steps (v7x has 2 TensorCores) while capping the
        # tile at TILE_R_MAX rows.
        chunks_per_tile = min(TILE_R_MAX // CHUNK_R, -(-n_chunks_total // 2))
        tile_r = chunks_per_tile * CHUNK_R

    rows_pad = _round_up(rows, tile_r)
    total = rows_pad * LANE
    if total > n:
        # Edge-replicate padding: padded lanes compute the same benign value as
        # the last real element (no NaN/Inf risk in 2*g*y + v0^2).
        x_flat = jnp.pad(x_flat, (0, total - n), mode="edge")
    x2d = x_flat.reshape(rows_pad, LANE)

    num_chunks = tile_r // chunk_r

    # Pre-folded scalars: [b2, 2*g, v0^2, sum_k w1*w2]
    scal = jnp.stack([
        jnp.asarray(b2, jnp.float32),
        jnp.asarray(2.0 * g, jnp.float32),
        jnp.asarray(v0 * v0, jnp.float32),
        jnp.sum(c),
    ]).astype(jnp.float32)

    grid = (rows_pad // tile_r,)

    out2d = pl.pallas_call(
        _make_kernel(HIDDEN, chunk_r, num_chunks, compute_dtype),
        out_shape=jax.ShapeDtypeStruct((rows_pad, LANE), jnp.float32),
        grid=grid,
        in_specs=[
            pl.BlockSpec(memory_space=pltpu.SMEM),   # w1
            pl.BlockSpec(memory_space=pltpu.SMEM),   # b1
            pl.BlockSpec(memory_space=pltpu.SMEM),   # w2
            pl.BlockSpec(memory_space=pltpu.SMEM),   # c = w1*w2
            pl.BlockSpec(memory_space=pltpu.SMEM),   # [b2, 2g, v0^2, sum(c)]
            pl.BlockSpec((tile_r, LANE), lambda i: (i, 0)),  # x tile
        ],
        out_specs=pl.BlockSpec((tile_r, LANE), lambda i: (i, 0)),
        compiler_params=pltpu.CompilerParams(
            dimension_semantics=("parallel",),       # shard row tiles across TCs
        ),
    )(w1, b1, w2, c, scal, x2d)

    return out2d.reshape(-1)[:n]


def _reference_forward(x, params, g, v0):
    """Pure-JAX f32 reference (analytic value_and_grad of the same MLP)."""
    w1, b1, w2, b2 = params
    xf = x.reshape(-1).astype(jnp.float32)
    pre = xf[:, None] * w1[None, :] + b1[None, :]     # (N, H)
    h = jnp.tanh(pre)
    y = h @ w2 + b2                                   # (N,)
    dydx = ((1.0 - h * h) * w1[None, :]) @ w2         # (N,)
    return jnp.sqrt((1.0 + dydx ** 2) / (2.0 * g * y + v0 ** 2))


if __name__ == "__main__":
    key = jax.random.PRNGKey(0)
    k_x, k_w1, k_b1, k_w2 = jax.random.split(key, 4)

    # Small, deterministic parameters for the synthetic net.
    # TODO(synk): the PyTorch module takes an arbitrary `net` with
    # value_and_grad; here it is realized as a fixed scalar tanh MLP with its
    # analytic derivative fused into the kernel.
    w1 = (0.5 * jax.random.normal(k_w1, (HIDDEN,))).astype(jnp.float32)
    b1 = (0.1 * jax.random.normal(k_b1, (HIDDEN,))).astype(jnp.float32)
    w2 = (0.1 * jax.random.normal(k_w2, (HIDDEN,))).astype(jnp.float32)
    b2 = jnp.float32(0.05)
    params = (w1, b1, w2, b2)

    g = 9.81
    v0 = 10.0  # keeps 2*g*y + v0^2 comfortably positive for random inputs

    # Example inputs: x of shape (2, 128) -> flattened length 256, t unused.
    x = jax.random.uniform(k_x, (2, 128), dtype=jnp.float32)
    t = jnp.zeros((2, 128), dtype=jnp.float32)

    compute_dtype = _pick_compute_dtype()
    out = brachistochrone_forward(x, t, params, g, v0, compute_dtype=compute_dtype)
    out = jax.block_until_ready(out)

    ref = _reference_forward(x, params, g, v0)
    assert out.shape == (x.size,)
    tol = 2e-2 if compute_dtype == jnp.bfloat16 else 1e-5
    assert jnp.allclose(out, ref, atol=tol, rtol=tol), (
        f"max abs err {jnp.max(jnp.abs(out - ref))}")

    print("KERNEL_OK")
</pallas_src>

<mosaic_0001>
module attributes {stable_mosaic.version = 11 : i64} {
  func.func @kernel(%arg0: i32, %arg1: memref<32xf32, #tpu.memory_space<smem>>, %arg2: memref<32xf32, #tpu.memory_space<smem>>, %arg3: memref<32xf32, #tpu.memory_space<smem>>, %arg4: memref<32xf32, #tpu.memory_space<smem>>, %arg5: memref<4xf32, #tpu.memory_space<smem>>, %arg6: memref<8x128xf32, #tpu.memory_space<vmem>>, %arg7: memref<8x128xf32, #tpu.memory_space<vmem>>) attributes {dimension_semantics = [#tpu.dimension_semantics<parallel>], iteration_bounds = array<i64: 1>, scalar_prefetch = 0 : i64, scratch_operands = 0 : i64, tpu.core_type = #tpu.core_type<tc>, window_params = [{transform_indices = @transform_0, window_bounds = array<i64: 32>}, {transform_indices = @transform_1, window_bounds = array<i64: 32>}, {transform_indices = @transform_2, window_bounds = array<i64: 32>}, {transform_indices = @transform_3, window_bounds = array<i64: 32>}, {transform_indices = @transform_4, window_bounds = array<i64: 4>}, {transform_indices = @transform_5, window_bounds = array<i64: 8, 128>}, {transform_indices = @transform_6, window_bounds = array<i64: 8, 128>}]} {
    %c0 = arith.constant 0 : index
    %0 = memref.load %arg5[%c0] : memref<4xf32, #tpu.memory_space<smem>>
    %c1 = arith.constant 1 : index
    %1 = memref.load %arg5[%c1] : memref<4xf32, #tpu.memory_space<smem>>
    %c2 = arith.constant 2 : index
    %2 = memref.load %arg5[%c2] : memref<4xf32, #tpu.memory_space<smem>>
    %c3 = arith.constant 3 : index
    %3 = memref.load %arg5[%c3] : memref<4xf32, #tpu.memory_space<smem>>
    %c0_i32 = arith.constant 0 : i32
    %c1_i32 = arith.constant 1 : i32
    %4 = arith.muli %c0_i32, %c1_i32 : i32
    %c0_i32_0 = arith.constant 0 : i32
    %5 = arith.addi %c0_i32_0, %4 : i32
    %c8_i32 = arith.constant 8 : i32
    %6 = arith.muli %5, %c8_i32 : i32
    %7 = tpu.assume_multiple %6, 8 : i32
    %8 = arith.index_cast %7 : i32 to index
    %c0_1 = arith.constant 0 : index
    %9 = vector.load %arg6[%8, %c0_1] : memref<8x128xf32, #tpu.memory_space<vmem>>, vector<8x128xf32>
    %cst = arith.constant 0.000000e+00 : f32
    %10 = vector.broadcast %cst : f32 to vector<8x128xf32>
    %cst_2 = arith.constant 0.000000e+00 : f32
    %11 = vector.broadcast %cst_2 : f32 to vector<8x128xf32>
    %c0_3 = arith.constant 0 : index
    %12 = memref.load %arg1[%c0_3] : memref<32xf32, #tpu.memory_space<smem>>
    %13 = vector.broadcast %12 : f32 to vector<8x128xf32>
    %14 = arith.mulf %13, %9 : vector<8x128xf32>
    %c0_4 = arith.constant 0 : index
    %15 = memref.load %arg2[%c0_4] : memref<32xf32, #tpu.memory_space<smem>>
    %16 = vector.broadcast %15 : f32 to vector<8x128xf32>
    %17 = arith.addf %14, %16 : vector<8x128xf32>
    %18 = math.tanh %17 : vector<8x128xf32>
    %c0_5 = arith.constant 0 : index
    %19 = memref.load %arg3[%c0_5] : memref<32xf32, #tpu.memory_space<smem>>
    %20 = vector.broadcast %19 : f32 to vector<8x128xf32>
    %21 = arith.mulf %20, %18 : vector<8x128xf32>
    %22 = arith.addf %10, %21 : vector<8x128xf32>
    %c0_6 = arith.constant 0 : index
    %23 = memref.load %arg4[%c0_6] : memref<32xf32, #tpu.memory_space<smem>>
    %24 = arith.mulf %18, %18 : vector<8x128xf32>
    %25 = vector.broadcast %23 : f32 to vector<8x128xf32>
    %26 = arith.mulf %25, %24 : vector<8x128xf32>
    %27 = arith.addf %11, %26 : vector<8x128xf32>
    %c1_7 = arith.constant 1 : index
    %28 = memref.load %arg1[%c1_7] : memref<32xf32, #tpu.memory_space<smem>>
    %29 = vector.broadcast %28 : f32 to vector<8x128xf32>
    %30 = arith.mulf %29, %9 : vector<8x128xf32>
    %c1_8 = arith.constant 1 : index
    %31 = memref.load %arg2[%c1_8] : memref<32xf32, #tpu.memory_space<smem>>
    %32 = vector.broadcast %31 : f32 to vector<8x128xf32>
    %33 = arith.addf %30, %32 : vector<8x128xf32>
    %34 = math.tanh %33 : vector<8x128xf32>
    %c1_9 = arith.constant 1 : index
    %35 = memref.load %arg3[%c1_9] : memref<32xf32, #tpu.memory_space<smem>>
    %36 = vector.broadcast %35 : f32 to vector<8x128xf32>
    %37 = arith.mulf %36, %34 : vector<8x128xf32>
    %38 = arith.addf %22, %37 : vector<8x128xf32>
    %c1_10 = arith.constant 1 : index
    %39 = memref.load %arg4[%c1_10] : memref<32xf32, #tpu.memory_space<smem>>
    %40 = arith.mulf %34, %34 : vector<8x128xf32>
    %41 = vector.broadcast %39 : f32 to vector<8x128xf32>
    %42 = arith.mulf %41, %40 : vector<8x128xf32>
    %43 = arith.addf %27, %42 : vector<8x128xf32>
    %c2_11 = arith.constant 2 : index
    %44 = memref.load %arg1[%c2_11] : memref<32xf32, #tpu.memory_space<smem>>
    %45 = vector.broadcast %44 : f32 to vector<8x128xf32>
    %46 = arith.mulf %45, %9 : vector<8x128xf32>
    %c2_12 = arith.constant 2 : index
    %47 = memref.load %arg2[%c2_12] : memref<32xf32, #tpu.memory_space<smem>>
    %48 = vector.broadcast %47 : f32 to vector<8x128xf32>
    %49 = arith.addf %46, %48 : vector<8x128xf32>
    %50 = math.tanh %49 : vector<8x128xf32>
    %c2_13 = arith.constant 2 : index
    %51 = memref.load %arg3[%c2_13] : memref<32xf32, #tpu.memory_space<smem>>
    %52 = vector.broadcast %51 : f32 to vector<8x128xf32>
    %53 = arith.mulf %52, %50 : vector<8x128xf32>
    %54 = arith.addf %38, %53 : vector<8x128xf32>
    %c2_14 = arith.constant 2 : index
    %55 = memref.load %arg4[%c2_14] : memref<32xf32, #tpu.memory_space<smem>>
    %56 = arith.mulf %50, %50 : vector<8x128xf32>
    %57 = vector.broadcast %55 : f32 to vector<8x128xf32>
    %58 = arith.mulf %57, %56 : vector<8x128xf32>
    %59 = arith.addf %43, %58 : vector<8x128xf32>
    %c3_15 = arith.constant 3 : index
    %60 = memref.load %arg1[%c3_15] : memref<32xf32, #tpu.memory_space<smem>>
    %61 = vector.broadcast %60 : f32 to vector<8x128xf32>
    %62 = arith.mulf %61, %9 : vector<8x128xf32>
    %c3_16 = arith.constant 3 : index
    %63 = memref.load %arg2[%c3_16] : memref<32xf32, #tpu.memory_space<smem>>
    %64 = vector.broadcast %63 : f32 to vector<8x128xf32>
    %65 = arith.addf %62, %64 : vector<8x128xf32>
    %66 = math.tanh %65 : vector<8x128xf32>
    %c3_17 = arith.constant 3 : index
    %67 = memref.load %arg3[%c3_17] : memref<32xf32, #tpu.memory_space<smem>>
    %68 = vector.broadcast %67 : f32 to vector<8x128xf32>
    %69 = arith.mulf %68, %66 : vector<8x128xf32>
    %70 = arith.addf %54, %69 : vector<8x128xf32>
    %c3_18 = arith.constant 3 : index
    %71 = memref.load %arg4[%c3_18] : memref<32xf32, #tpu.memory_space<smem>>
    %72 = arith.mulf %66, %66 : vector<8x128xf32>
    %73 = vector.broadcast %71 : f32 to vector<8x128xf32>
    %74 = arith.mulf %73, %72 : vector<8x128xf32>
    %75 = arith.addf %59, %74 : vector<8x128xf32>
    %c4 = arith.constant 4 : index
    %76 = memref.load %arg1[%c4] : memref<32xf32, #tpu.memory_space<smem>>
    %77 = vector.broadcast %76 : f32 to vector<8x128xf32>
    %78 = arith.mulf %77, %9 : vector<8x128xf32>
    %c4_19 = arith.constant 4 : index
    %79 = memref.load %arg2[%c4_19] : memref<32xf32, #tpu.memory_space<smem>>
    %80 = vector.broadcast %79 : f32 to vector<8x128xf32>
    %81 = arith.addf %78, %80 : vector<8x128xf32>
    %82 = math.tanh %81 : vector<8x128xf32>
    %c4_20 = arith.constant 4 : index
    %83 = memref.load %arg3[%c4_20] : memref<32xf32, #tpu.memory_space<smem>>
    %84 = vector.broadcast %83 : f32 to vector<8x128xf32>
    %85 = arith.mulf %84, %82 : vector<8x128xf32>
    %86 = arith.addf %70, %85 : vector<8x128xf32>
    %c4_21 = arith.constant 4 : index
    %87 = memref.load %arg4[%c4_21] : memref<32xf32, #tpu.memory_space<smem>>
    %88 = arith.mulf %82, %82 : vector<8x128xf32>
    %89 = vector.broadcast %87 : f32 to vector<8x128xf32>
    %90 = arith.mulf %89, %88 : vector<8x128xf32>
    %91 = arith.addf %75, %90 : vector<8x128xf32>
    %c5 = arith.constant 5 : index
    %92 = memref.load %arg1[%c5] : memref<32xf32, #tpu.memory_space<smem>>
    %93 = vector.broadcast %92 : f32 to vector<8x128xf32>
    %94 = arith.mulf %93, %9 : vector<8x128xf32>
    %c5_22 = arith.constant 5 : index
    %95 = memref.load %arg2[%c5_22] : memref<32xf32, #tpu.memory_space<smem>>
    %96 = vector.broadcast %95 : f32 to vector<8x128xf32>
    %97 = arith.addf %94, %96 : vector<8x128xf32>
    %98 = math.tanh %97 : vector<8x128xf32>
    %c5_23 = arith.constant 5 : index
    %99 = memref.load %arg3[%c5_23] : memref<32xf32, #tpu.memory_space<smem>>
    %100 = vector.broadcast %99 : f32 to vector<8x128xf32>
    %101 = arith.mulf %100, %98 : vector<8x128xf32>
    %102 = arith.addf %86, %101 : vector<8x128xf32>
    %c5_24 = arith.constant 5 : index
    %103 = memref.load %arg4[%c5_24] : memref<32xf32, #tpu.memory_space<smem>>
    %104 = arith.mulf %98, %98 : vector<8x128xf32>
    %105 = vector.broadcast %103 : f32 to vector<8x128xf32>
    %106 = arith.mulf %105, %104 : vector<8x128xf32>
    %107 = arith.addf %91, %106 : vector<8x128xf32>
    %c6 = arith.constant 6 : index
    %108 = memref.load %arg1[%c6] : memref<32xf32, #tpu.memory_space<smem>>
    %109 = vector.broadcast %108 : f32 to vector<8x128xf32>
    %110 = arith.mulf %109, %9 : vector<8x128xf32>
    %c6_25 = arith.constant 6 : index
    %111 = memref.load %arg2[%c6_25] : memref<32xf32, #tpu.memory_space<smem>>
    %112 = vector.broadcast %111 : f32 to vector<8x128xf32>
    %113 = arith.addf %110, %112 : vector<8x128xf32>
    %114 = math.tanh %113 : vector<8x128xf32>
    %c6_26 = arith.constant 6 : index
    %115 = memref.load %arg3[%c6_26] : memref<32xf32, #tpu.memory_space<smem>>
    %116 = vector.broadcast %115 : f32 to vector<8x128xf32>
    %117 = arith.mulf %116, %114 : vector<8x128xf32>
    %118 = arith.addf %102, %117 : vector<8x128xf32>
    %c6_27 = arith.constant 6 : index
    %119 = memref.load %arg4[%c6_27] : memref<32xf32, #tpu.memory_space<smem>>
    %120 = arith.mulf %114, %114 : vector<8x128xf32>
    %121 = vector.broadcast %119 : f32 to vector<8x128xf32>
    %122 = arith.mulf %121, %120 : vector<8x128xf32>
    %123 = arith.addf %107, %122 : vector<8x128xf32>
    %c7 = arith.constant 7 : index
    %124 = memref.load %arg1[%c7] : memref<32xf32, #tpu.memory_space<smem>>
    %125 = vector.broadcast %124 : f32 to vector<8x128xf32>
    %126 = arith.mulf %125, %9 : vector<8x128xf32>
    %c7_28 = arith.constant 7 : index
    %127 = memref.load %arg2[%c7_28] : memref<32xf32, #tpu.memory_space<smem>>
    %128 = vector.broadcast %127 : f32 to vector<8x128xf32>
    %129 = arith.addf %126, %128 : vector<8x128xf32>
    %130 = math.tanh %129 : vector<8x128xf32>
    %c7_29 = arith.constant 7 : index
    %131 = memref.load %arg3[%c7_29] : memref<32xf32, #tpu.memory_space<smem>>
    %132 = vector.broadcast %131 : f32 to vector<8x128xf32>
    %133 = arith.mulf %132, %130 : vector<8x128xf32>
    %134 = arith.addf %118, %133 : vector<8x128xf32>
    %c7_30 = arith.constant 7 : index
    %135 = memref.load %arg4[%c7_30] : memref<32xf32, #tpu.memory_space<smem>>
    %136 = arith.mulf %130, %130 : vector<8x128xf32>
    %137 = vector.broadcast %135 : f32 to vector<8x128xf32>
    %138 = arith.mulf %137, %136 : vector<8x128xf32>
    %139 = arith.addf %123, %138 : vector<8x128xf32>
    %c8 = arith.constant 8 : index
    %140 = memref.load %arg1[%c8] : memref<32xf32, #tpu.memory_space<smem>>
    %141 = vector.broadcast %140 : f32 to vector<8x128xf32>
    %142 = arith.mulf %141, %9 : vector<8x128xf32>
    %c8_31 = arith.constant 8 : index
    %143 = memref.load %arg2[%c8_31] : memref<32xf32, #tpu.memory_space<smem>>
    %144 = vector.broadcast %143 : f32 to vector<8x128xf32>
    %145 = arith.addf %142, %144 : vector<8x128xf32>
    %146 = math.tanh %145 : vector<8x128xf32>
    %c8_32 = arith.constant 8 : index
    %147 = memref.load %arg3[%c8_32] : memref<32xf32, #tpu.memory_space<smem>>
    %148 = vector.broadcast %147 : f32 to vector<8x128xf32>
    %149 = arith.mulf %148, %146 : vector<8x128xf32>
    %150 = arith.addf %134, %149 : vector<8x128xf32>
    %c8_33 = arith.constant 8 : index
    %151 = memref.load %arg4[%c8_33] : memref<32xf32, #tpu.memory_space<smem>>
    %152 = arith.mulf %146, %146 : vector<8x128xf32>
    %153 = vector.broadcast %151 : f32 to vector<8x128xf32>
    %154 = arith.mulf %153, %152 : vector<8x128xf32>
    %155 = arith.addf %139, %154 : vector<8x128xf32>
    %c9 = arith.constant 9 : index
    %156 = memref.load %arg1[%c9] : memref<32xf32, #tpu.memory_space<smem>>
    %157 = vector.broadcast %156 : f32 to vector<8x128xf32>
    %158 = arith.mulf %157, %9 : vector<8x128xf32>
    %c9_34 = arith.constant 9 : index
    %159 = memref.load %arg2[%c9_34] : memref<32xf32, #tpu.memory_space<smem>>
    %160 = vector.broadcast %159 : f32 to vector<8x128xf32>
    %161 = arith.addf %158, %160 : vector<8x128xf32>
    %162 = math.tanh %161 : vector<8x128xf32>
    %c9_35 = arith.constant 9 : index
    %163 = memref.load %arg3[%c9_35] : memref<32xf32, #tpu.memory_space<smem>>
    %164 = vector.broadcast %163 : f32 to vector<8x128xf32>
    %165 = arith.mulf %164, %162 : vector<8x128xf32>
    %166 = arith.addf %150, %165 : vector<8x128xf32>
    %c9_36 = arith.constant 9 : index
    %167 = memref.load %arg4[%c9_36] : memref<32xf32, #tpu.memory_space<smem>>
    %168 = arith.mulf %162, %162 : vector<8x128xf32>
    %169 = vector.broadcast %167 : f32 to vector<8x128xf32>
    %170 = arith.mulf %169, %168 : vector<8x128xf32>
    %171 = arith.addf %155, %170 : vector<8x128xf32>
    %c10 = arith.constant 10 : index
    %172 = memref.load %arg1[%c10] : memref<32xf32, #tpu.memory_space<smem>>
    %173 = vector.broadcast %172 : f32 to vector<8x128xf32>
    %174 = arith.mulf %173, %9 : vector<8x128xf32>
    %c10_37 = arith.constant 10 : index
    %175 = memref.load %arg2[%c10_37] : memref<32xf32, #tpu.memory_space<smem>>
    %176 = vector.broadcast %175 : f32 to vector<8x128xf32>
    %177 = arith.addf %174, %176 : vector<8x128xf32>
    %178 = math.tanh %177 : vector<8x128xf32>
    %c10_38 = arith.constant 10 : index
    %179 = memref.load %arg3[%c10_38] : memref<32xf32, #tpu.memory_space<smem>>
    %180 = vector.broadcast %179 : f32 to vector<8x128xf32>
    %181 = arith.mulf %180, %178 : vector<8x128xf32>
    %182 = arith.addf %166, %181 : vector<8x128xf32>
    %c10_39 = arith.constant 10 : index
    %183 = memref.load %arg4[%c10_39] : memref<32xf32, #tpu.memory_space<smem>>
    %184 = arith.mulf %178, %178 : vector<8x128xf32>
    %185 = vector.broadcast %183 : f32 to vector<8x128xf32>
    %186 = arith.mulf %185, %184 : vector<8x128xf32>
    %187 = arith.addf %171, %186 : vector<8x128xf32>
    %c11 = arith.constant 11 : index
    %188 = memref.load %arg1[%c11] : memref<32xf32, #tpu.memory_space<smem>>
    %189 = vector.broadcast %188 : f32 to vector<8x128xf32>
    %190 = arith.mulf %189, %9 : vector<8x128xf32>
    %c11_40 = arith.constant 11 : index
    %191 = memref.load %arg2[%c11_40] : memref<32xf32, #tpu.memory_space<smem>>
    %192 = vector.broadcast %191 : f32 to vector<8x128xf32>
    %193 = arith.addf %190, %192 : vector<8x128xf32>
    %194 = math.tanh %193 : vector<8x128xf32>
    %c11_41 = arith.constant 11 : index
    %195 = memref.load %arg3[%c11_41] : memref<32xf32, #tpu.memory_space<smem>>
    %196 = vector.broadcast %195 : f32 to vector<8x128xf32>
    %197 = arith.mulf %196, %194 : vector<8x128xf32>
    %198 = arith.addf %182, %197 : vector<8x128xf32>
    %c11_42 = arith.constant 11 : index
    %199 = memref.load %arg4[%c11_42] : memref<32xf32, #tpu.memory_space<smem>>
    %200 = arith.mulf %194, %194 : vector<8x128xf32>
    %201 = vector.broadcast %199 : f32 to vector<8x128xf32>
    %202 = arith.mulf %201, %200 : vector<8x128xf32>
    %203 = arith.addf %187, %202 : vector<8x128xf32>
    %c12 = arith.constant 12 : index
    %204 = memref.load %arg1[%c12] : memref<32xf32, #tpu.memory_space<smem>>
    %205 = vector.broadcast %204 : f32 to vector<8x128xf32>
    %206 = arith.mulf %205, %9 : vector<8x128xf32>
    %c12_43 = arith.constant 12 : index
    %207 = memref.load %arg2[%c12_43] : memref<32xf32, #tpu.memory_space<smem>>
    %208 = vector.broadcast %207 : f32 to vector<8x128xf32>
    %209 = arith.addf %206, %208 : vector<8x128xf32>
    %210 = math.tanh %209 : vector<8x128xf32>
    %c12_44 = arith.constant 12 : index
    %211 = memref.load %arg3[%c12_44] : memref<32xf32, #tpu.memory_space<smem>>
    %212 = vector.broadcast %211 : f32 to vector<8x128xf32>
    %213 = arith.mulf %212, %210 : vector<8x128xf32>
    %214 = arith.addf %198, %213 : vector<8x128xf32>
    %c12_45 = arith.constant 12 : index
    %215 = memref.load %arg4[%c12_45] : memref<32xf32, #tpu.memory_space<smem>>
    %216 = arith.mulf %210, %210 : vector<8x128xf32>
    %217 = vector.broadcast %215 : f32 to vector<8x128xf32>
    %218 = arith.mulf %217, %216 : vector<8x128xf32>
    %219 = arith.addf %203, %218 : vector<8x128xf32>
    %c13 = arith.constant 13 : index
    %220 = memref.load %arg1[%c13] : memref<32xf32, #tpu.memory_space<smem>>
    %221 = vector.broadcast %220 : f32 to vector<8x128xf32>
    %222 = arith.mulf %221, %9 : vector<8x128xf32>
    %c13_46 = arith.constant 13 : index
    %223 = memref.load %arg2[%c13_46] : memref<32xf32, #tpu.memory_space<smem>>
    %224 = vector.broadcast %223 : f32 to vector<8x128xf32>
    %225 = arith.addf %222, %224 : vector<8x128xf32>
    %226 = math.tanh %225 : vector<8x128xf32>
    %c13_47 = arith.constant 13 : index
    %227 = memref.load %arg3[%c13_47] : memref<32xf32, #tpu.memory_space<smem>>
    %228 = vector.broadcast %227 : f32 to vector<8x128xf32>
    %229 = arith.mulf %228, %226 : vector<8x128xf32>
    %230 = arith.addf %214, %229 : vector<8x128xf32>
    %c13_48 = arith.constant 13 : index
    %231 = memref.load %arg4[%c13_48] : memref<32xf32, #tpu.memory_space<smem>>
    %232 = arith.mulf %226, %226 : vector<8x128xf32>
    %233 = vector.broadcast %231 : f32 to vector<8x128xf32>
    %234 = arith.mulf %233, %232 : vector<8x128xf32>
    %235 = arith.addf %219, %234 : vector<8x128xf32>
    %c14 = arith.constant 14 : index
    %236 = memref.load %arg1[%c14] : memref<32xf32, #tpu.memory_space<smem>>
    %237 = vector.broadcast %236 : f32 to vector<8x128xf32>
    %238 = arith.mulf %237, %9 : vector<8x128xf32>
    %c14_49 = arith.constant 14 : index
    %239 = memref.load %arg2[%c14_49] : memref<32xf32, #tpu.memory_space<smem>>
    %240 = vector.broadcast %239 : f32 to vector<8x128xf32>
    %241 = arith.addf %238, %240 : vector<8x128xf32>
    %242 = math.tanh %241 : vector<8x128xf32>
    %c14_50 = arith.constant 14 : index
    %243 = memref.load %arg3[%c14_50] : memref<32xf32, #tpu.memory_space<smem>>
    %244 = vector.broadcast %243 : f32 to vector<8x128xf32>
    %245 = arith.mulf %244, %242 : vector<8x128xf32>
    %246 = arith.addf %230, %245 : vector<8x128xf32>
    %c14_51 = arith.constant 14 : index
    %247 = memref.load %arg4[%c14_51] : memref<32xf32, #tpu.memory_space<smem>>
    %248 = arith.mulf %242, %242 : vector<8x128xf32>
    %249 = vector.broadcast %247 : f32 to vector<8x128xf32>
    %250 = arith.mulf %249, %248 : vector<8x128xf32>
    %251 = arith.addf %235, %250 : vector<8x128xf32>
    %c15 = arith.constant 15 : index
    %252 = memref.load %arg1[%c15] : memref<32xf32, #tpu.memory_space<smem>>
    %253 = vector.broadcast %252 : f32 to vector<8x128xf32>
    %254 = arith.mulf %253, %9 : vector<8x128xf32>
    %c15_52 = arith.constant 15 : index
    %255 = memref.load %arg2[%c15_52] : memref<32xf32, #tpu.memory_space<smem>>
    %256 = vector.broadcast %255 : f32 to vector<8x128xf32>
    %257 = arith.addf %254, %256 : vector<8x128xf32>
    %258 = math.tanh %257 : vector<8x128xf32>
    %c15_53 = arith.constant 15 : index
    %259 = memref.load %arg3[%c15_53] : memref<32xf32, #tpu.memory_space<smem>>
    %260 = vector.broadcast %259 : f32 to vector<8x128xf32>
    %261 = arith.mulf %260, %258 : vector<8x128xf32>
    %262 = arith.addf %246, %261 : vector<8x128xf32>
    %c15_54 = arith.constant 15 : index
    %263 = memref.load %arg4[%c15_54] : memref<32xf32, #tpu.memory_space<smem>>
    %264 = arith.mulf %258, %258 : vector<8x128xf32>
    %265 = vector.broadcast %263 : f32 to vector<8x128xf32>
    %266 = arith.mulf %265, %264 : vector<8x128xf32>
    %267 = arith.addf %251, %266 : vector<8x128xf32>
    %c16 = arith.constant 16 : index
    %268 = memref.load %arg1[%c16] : memref<32xf32, #tpu.memory_space<smem>>
    %269 = vector.broadcast %268 : f32 to vector<8x128xf32>
    %270 = arith.mulf %269, %9 : vector<8x128xf32>
    %c16_55 = arith.constant 16 : index
    %271 = memref.load %arg2[%c16_55] : memref<32xf32, #tpu.memory_space<smem>>
    %272 = vector.broadcast %271 : f32 to vector<8x128xf32>
    %273 = arith.addf %270, %272 : vector<8x128xf32>
    %274 = math.tanh %273 : vector<8x128xf32>
    %c16_56 = arith.constant 16 : index
    %275 = memref.load %arg3[%c16_56] : memref<32xf32, #tpu.memory_space<smem>>
    %276 = vector.broadcast %275 : f32 to vector<8x128xf32>
    %277 = arith.mulf %276, %274 : vector<8x128xf32>
    %278 = arith.addf %262, %277 : vector<8x128xf32>
    %c16_57 = arith.constant 16 : index
    %279 = memref.load %arg4[%c16_57] : memref<32xf32, #tpu.memory_space<smem>>
    %280 = arith.mulf %274, %274 : vector<8x128xf32>
    %281 = vector.broadcast %279 : f32 to vector<8x128xf32>
    %282 = arith.mulf %281, %280 : vector<8x128xf32>
    %283 = arith.addf %267, %282 : vector<8x128xf32>
    %c17 = arith.constant 17 : index
    %284 = memref.load %arg1[%c17] : memref<32xf32, #tpu.memory_space<smem>>
    %285 = vector.broadcast %284 : f32 to vector<8x128xf32>
    %286 = arith.mulf %285, %9 : vector<8x128xf32>
    %c17_58 = arith.constant 17 : index
    %287 = memref.load %arg2[%c17_58] : memref<32xf32, #tpu.memory_space<smem>>
    %288 = vector.broadcast %287 : f32 to vector<8x128xf32>
    %289 = arith.addf %286, %288 : vector<8x128xf32>
    %290 = math.tanh %289 : vector<8x128xf32>
    %c17_59 = arith.constant 17 : index
    %291 = memref.load %arg3[%c17_59] : memref<32xf32, #tpu.memory_space<smem>>
    %292 = vector.broadcast %291 : f32 to vector<8x128xf32>
    %293 = arith.mulf %292, %290 : vector<8x128xf32>
    %294 = arith.addf %278, %293 : vector<8x128xf32>
    %c17_60 = arith.constant 17 : index
    %295 = memref.load %arg4[%c17_60] : memref<32xf32, #tpu.memory_space<smem>>
    %296 = arith.mulf %290, %290 : vector<8x128xf32>
    %297 = vector.broadcast %295 : f32 to vector<8x128xf32>
    %298 = arith.mulf %297, %296 : vector<8x128xf32>
    %299 = arith.addf %283, %298 : vector<8x128xf32>
    %c18 = arith.constant 18 : index
    %300 = memref.load %arg1[%c18] : memref<32xf32, #tpu.memory_space<smem>>
    %301 = vector.broadcast %300 : f32 to vector<8x128xf32>
    %302 = arith.mulf %301, %9 : vector<8x128xf32>
    %c18_61 = arith.constant 18 : index
    %303 = memref.load %arg2[%c18_61] : memref<32xf32, #tpu.memory_space<smem>>
    %304 = vector.broadcast %303 : f32 to vector<8x128xf32>
    %305 = arith.addf %302, %304 : vector<8x128xf32>
    %306 = math.tanh %305 : vector<8x128xf32>
    %c18_62 = arith.constant 18 : index
    %307 = memref.load %arg3[%c18_62] : memref<32xf32, #tpu.memory_space<smem>>
    %308 = vector.broadcast %307 : f32 to vector<8x128xf32>
    %309 = arith.mulf %308, %306 : vector<8x128xf32>
    %310 = arith.addf %294, %309 : vector<8x128xf32>
    %c18_63 = arith.constant 18 : index
    %311 = memref.load %arg4[%c18_63] : memref<32xf32, #tpu.memory_space<smem>>
    %312 = arith.mulf %306, %306 : vector<8x128xf32>
    %313 = vector.broadcast %311 : f32 to vector<8x128xf32>
    %314 = arith.mulf %313, %312 : vector<8x128xf32>
    %315 = arith.addf %299, %314 : vector<8x128xf32>
    %c19 = arith.constant 19 : index
    %316 = memref.load %arg1[%c19] : memref<32xf32, #tpu.memory_space<smem>>
    %317 = vector.broadcast %316 : f32 to vector<8x128xf32>
    %318 = arith.mulf %317, %9 : vector<8x128xf32>
    %c19_64 = arith.constant 19 : index
    %319 = memref.load %arg2[%c19_64] : memref<32xf32, #tpu.memory_space<smem>>
    %320 = vector.broadcast %319 : f32 to vector<8x128xf32>
    %321 = arith.addf %318, %320 : vector<8x128xf32>
    %322 = math.tanh %321 : vector<8x128xf32>
    %c19_65 = arith.constant 19 : index
    %323 = memref.load %arg3[%c19_65] : memref<32xf32, #tpu.memory_space<smem>>
    %324 = vector.broadcast %323 : f32 to vector<8x128xf32>
    %325 = arith.mulf %324, %322 : vector<8x128xf32>
    %326 = arith.addf %310, %325 : vector<8x128xf32>
    %c19_66 = arith.constant 19 : index
    %327 = memref.load %arg4[%c19_66] : memref<32xf32, #tpu.memory_space<smem>>
    %328 = arith.mulf %322, %322 : vector<8x128xf32>
    %329 = vector.broadcast %327 : f32 to vector<8x128xf32>
    %330 = arith.mulf %329, %328 : vector<8x128xf32>
    %331 = arith.addf %315, %330 : vector<8x128xf32>
    %c20 = arith.constant 20 : index
    %332 = memref.load %arg1[%c20] : memref<32xf32, #tpu.memory_space<smem>>
    %333 = vector.broadcast %332 : f32 to vector<8x128xf32>
    %334 = arith.mulf %333, %9 : vector<8x128xf32>
    %c20_67 = arith.constant 20 : index
    %335 = memref.load %arg2[%c20_67] : memref<32xf32, #tpu.memory_space<smem>>
    %336 = vector.broadcast %335 : f32 to vector<8x128xf32>
    %337 = arith.addf %334, %336 : vector<8x128xf32>
    %338 = math.tanh %337 : vector<8x128xf32>
    %c20_68 = arith.constant 20 : index
    %339 = memref.load %arg3[%c20_68] : memref<32xf32, #tpu.memory_space<smem>>
    %340 = vector.broadcast %339 : f32 to vector<8x128xf32>
    %341 = arith.mulf %340, %338 : vector<8x128xf32>
    %342 = arith.addf %326, %341 : vector<8x128xf32>
    %c20_69 = arith.constant 20 : index
    %343 = memref.load %arg4[%c20_69] : memref<32xf32, #tpu.memory_space<smem>>
    %344 = arith.mulf %338, %338 : vector<8x128xf32>
    %345 = vector.broadcast %343 : f32 to vector<8x128xf32>
    %346 = arith.mulf %345, %344 : vector<8x128xf32>
    %347 = arith.addf %331, %346 : vector<8x128xf32>
    %c21 = arith.constant 21 : index
    %348 = memref.load %arg1[%c21] : memref<32xf32, #tpu.memory_space<smem>>
    %349 = vector.broadcast %348 : f32 to vector<8x128xf32>
    %350 = arith.mulf %349, %9 : vector<8x128xf32>
    %c21_70 = arith.constant 21 : index
    %351 = memref.load %arg2[%c21_70] : memref<32xf32, #tpu.memory_space<smem>>
    %352 = vector.broadcast %351 : f32 to vector<8x128xf32>
    %353 = arith.addf %350, %352 : vector<8x128xf32>
    %354 = math.tanh %353 : vector<8x128xf32>
    %c21_71 = arith.constant 21 : index
    %355 = memref.load %arg3[%c21_71] : memref<32xf32, #tpu.memory_space<smem>>
    %356 = vector.broadcast %355 : f32 to vector<8x128xf32>
    %357 = arith.mulf %356, %354 : vector<8x128xf32>
    %358 = arith.addf %342, %357 : vector<8x128xf32>
    %c21_72 = arith.constant 21 : index
    %359 = memref.load %arg4[%c21_72] : memref<32xf32, #tpu.memory_space<smem>>
    %360 = arith.mulf %354, %354 : vector<8x128xf32>
    %361 = vector.broadcast %359 : f32 to vector<8x128xf32>
    %362 = arith.mulf %361, %360 : vector<8x128xf32>
    %363 = arith.addf %347, %362 : vector<8x128xf32>
    %c22 = arith.constant 22 : index
    %364 = memref.load %arg1[%c22] : memref<32xf32, #tpu.memory_space<smem>>
    %365 = vector.broadcast %364 : f32 to vector<8x128xf32>
    %366 = arith.mulf %365, %9 : vector<8x128xf32>
    %c22_73 = arith.constant 22 : index
    %367 = memref.load %arg2[%c22_73] : memref<32xf32, #tpu.memory_space<smem>>
    %368 = vector.broadcast %367 : f32 to vector<8x128xf32>
    %369 = arith.addf %366, %368 : vector<8x128xf32>
    %370 = math.tanh %369 : vector<8x128xf32>
    %c22_74 = arith.constant 22 : index
    %371 = memref.load %arg3[%c22_74] : memref<32xf32, #tpu.memory_space<smem>>
    %372 = vector.broadcast %371 : f32 to vector<8x128xf32>
    %373 = arith.mulf %372, %370 : vector<8x128xf32>
    %374 = arith.addf %358, %373 : vector<8x128xf32>
    %c22_75 = arith.constant 22 : index
    %375 = memref.load %arg4[%c22_75] : memref<32xf32, #tpu.memory_space<smem>>
    %376 = arith.mulf %370, %370 : vector<8x128xf32>
    %377 = vector.broadcast %375 : f32 to vector<8x128xf32>
    %378 = arith.mulf %377, %376 : vector<8x128xf32>
    %379 = arith.addf %363, %378 : vector<8x128xf32>
    %c23 = arith.constant 23 : index
    %380 = memref.load %arg1[%c23] : memref<32xf32, #tpu.memory_space<smem>>
    %381 = vector.broadcast %380 : f32 to vector<8x128xf32>
    %382 = arith.mulf %381, %9 : vector<8x128xf32>
    %c23_76 = arith.constant 23 : index
    %383 = memref.load %arg2[%c23_76] : memref<32xf32, #tpu.memory_space<smem>>
    %384 = vector.broadcast %383 : f32 to vector<8x128xf32>
    %385 = arith.addf %382, %384 : vector<8x128xf32>
    %386 = math.tanh %385 : vector<8x128xf32>
    %c23_77 = arith.constant 23 : index
    %387 = memref.load %arg3[%c23_77] : memref<32xf32, #tpu.memory_space<smem>>
    %388 = vector.broadcast %387 : f32 to vector<8x128xf32>
    %389 = arith.mulf %388, %386 : vector<8x128xf32>
    %390 = arith.addf %374, %389 : vector<8x128xf32>
    %c23_78 = arith.constant 23 : index
    %391 = memref.load %arg4[%c23_78] : memref<32xf32, #tpu.memory_space<smem>>
    %392 = arith.mulf %386, %386 : vector<8x128xf32>
    %393 = vector.broadcast %391 : f32 to vector<8x128xf32>
    %394 = arith.mulf %393, %392 : vector<8x128xf32>
    %395 = arith.addf %379, %394 : vector<8x128xf32>
    %c24 = arith.constant 24 : index
    %396 = memref.load %arg1[%c24] : memref<32xf32, #tpu.memory_space<smem>>
    %397 = vector.broadcast %396 : f32 to vector<8x128xf32>
    %398 = arith.mulf %397, %9 : vector<8x128xf32>
    %c24_79 = arith.constant 24 : index
    %399 = memref.load %arg2[%c24_79] : memref<32xf32, #tpu.memory_space<smem>>
    %400 = vector.broadcast %399 : f32 to vector<8x128xf32>
    %401 = arith.addf %398, %400 : vector<8x128xf32>
    %402 = math.tanh %401 : vector<8x128xf32>
    %c24_80 = arith.constant 24 : index
    %403 = memref.load %arg3[%c24_80] : memref<32xf32, #tpu.memory_space<smem>>
    %404 = vector.broadcast %403 : f32 to vector<8x128xf32>
    %405 = arith.mulf %404, %402 : vector<8x128xf32>
    %406 = arith.addf %390, %405 : vector<8x128xf32>
    %c24_81 = arith.constant 24 : index
    %407 = memref.load %arg4[%c24_81] : memref<32xf32, #tpu.memory_space<smem>>
    %408 = arith.mulf %402, %402 : vector<8x128xf32>
    %409 = vector.broadcast %407 : f32 to vector<8x128xf32>
    %410 = arith.mulf %409, %408 : vector<8x128xf32>
    %411 = arith.addf %395, %410 : vector<8x128xf32>
    %c25 = arith.constant 25 : index
    %412 = memref.load %arg1[%c25] : memref<32xf32, #tpu.memory_space<smem>>
    %413 = vector.broadcast %412 : f32 to vector<8x128xf32>
    %414 = arith.mulf %413, %9 : vector<8x128xf32>
    %c25_82 = arith.constant 25 : index
    %415 = memref.load %arg2[%c25_82] : memref<32xf32, #tpu.memory_space<smem>>
    %416 = vector.broadcast %415 : f32 to vector<8x128xf32>
    %417 = arith.addf %414, %416 : vector<8x128xf32>
    %418 = math.tanh %417 : vector<8x128xf32>
    %c25_83 = arith.constant 25 : index
    %419 = memref.load %arg3[%c25_83] : memref<32xf32, #tpu.memory_space<smem>>
    %420 = vector.broadcast %419 : f32 to vector<8x128xf32>
    %421 = arith.mulf %420, %418 : vector<8x128xf32>
    %422 = arith.addf %406, %421 : vector<8x128xf32>
    %c25_84 = arith.constant 25 : index
    %423 = memref.load %arg4[%c25_84] : memref<32xf32, #tpu.memory_space<smem>>
    %424 = arith.mulf %418, %418 : vector<8x128xf32>
    %425 = vector.broadcast %423 : f32 to vector<8x128xf32>
    %426 = arith.mulf %425, %424 : vector<8x128xf32>
    %427 = arith.addf %411, %426 : vector<8x128xf32>
    %c26 = arith.constant 26 : index
    %428 = memref.load %arg1[%c26] : memref<32xf32, #tpu.memory_space<smem>>
    %429 = vector.broadcast %428 : f32 to vector<8x128xf32>
    %430 = arith.mulf %429, %9 : vector<8x128xf32>
    %c26_85 = arith.constant 26 : index
    %431 = memref.load %arg2[%c26_85] : memref<32xf32, #tpu.memory_space<smem>>
    %432 = vector.broadcast %431 : f32 to vector<8x128xf32>
    %433 = arith.addf %430, %432 : vector<8x128xf32>
    %434 = math.tanh %433 : vector<8x128xf32>
    %c26_86 = arith.constant 26 : index
    %435 = memref.load %arg3[%c26_86] : memref<32xf32, #tpu.memory_space<smem>>
    %436 = vector.broadcast %435 : f32 to vector<8x128xf32>
    %437 = arith.mulf %436, %434 : vector<8x128xf32>
    %438 = arith.addf %422, %437 : vector<8x128xf32>
    %c26_87 = arith.constant 26 : index
    %439 = memref.load %arg4[%c26_87] : memref<32xf32, #tpu.memory_space<smem>>
    %440 = arith.mulf %434, %434 : vector<8x128xf32>
    %441 = vector.broadcast %439 : f32 to vector<8x128xf32>
    %442 = arith.mulf %441, %440 : vector<8x128xf32>
    %443 = arith.addf %427, %442 : vector<8x128xf32>
    %c27 = arith.constant 27 : index
    %444 = memref.load %arg1[%c27] : memref<32xf32, #tpu.memory_space<smem>>
    %445 = vector.broadcast %444 : f32 to vector<8x128xf32>
    %446 = arith.mulf %445, %9 : vector<8x128xf32>
    %c27_88 = arith.constant 27 : index
    %447 = memref.load %arg2[%c27_88] : memref<32xf32, #tpu.memory_space<smem>>
    %448 = vector.broadcast %447 : f32 to vector<8x128xf32>
    %449 = arith.addf %446, %448 : vector<8x128xf32>
    %450 = math.tanh %449 : vector<8x128xf32>
    %c27_89 = arith.constant 27 : index
    %451 = memref.load %arg3[%c27_89] : memref<32xf32, #tpu.memory_space<smem>>
    %452 = vector.broadcast %451 : f32 to vector<8x128xf32>
    %453 = arith.mulf %452, %450 : vector<8x128xf32>
    %454 = arith.addf %438, %453 : vector<8x128xf32>
    %c27_90 = arith.constant 27 : index
    %455 = memref.load %arg4[%c27_90] : memref<32xf32, #tpu.memory_space<smem>>
    %456 = arith.mulf %450, %450 : vector<8x128xf32>
    %457 = vector.broadcast %455 : f32 to vector<8x128xf32>
    %458 = arith.mulf %457, %456 : vector<8x128xf32>
    %459 = arith.addf %443, %458 : vector<8x128xf32>
    %c28 = arith.constant 28 : index
    %460 = memref.load %arg1[%c28] : memref<32xf32, #tpu.memory_space<smem>>
    %461 = vector.broadcast %460 : f32 to vector<8x128xf32>
    %462 = arith.mulf %461, %9 : vector<8x128xf32>
    %c28_91 = arith.constant 28 : index
    %463 = memref.load %arg2[%c28_91] : memref<32xf32, #tpu.memory_space<smem>>
    %464 = vector.broadcast %463 : f32 to vector<8x128xf32>
    %465 = arith.addf %462, %464 : vector<8x128xf32>
    %466 = math.tanh %465 : vector<8x128xf32>
    %c28_92 = arith.constant 28 : index
    %467 = memref.load %arg3[%c28_92] : memref<32xf32, #tpu.memory_space<smem>>
    %468 = vector.broadcast %467 : f32 to vector<8x128xf32>
    %469 = arith.mulf %468, %466 : vector<8x128xf32>
    %470 = arith.addf %454, %469 : vector<8x128xf32>
    %c28_93 = arith.constant 28 : index
    %471 = memref.load %arg4[%c28_93] : memref<32xf32, #tpu.memory_space<smem>>
    %472 = arith.mulf %466, %466 : vector<8x128xf32>
    %473 = vector.broadcast %471 : f32 to vector<8x128xf32>
    %474 = arith.mulf %473, %472 : vector<8x128xf32>
    %475 = arith.addf %459, %474 : vector<8x128xf32>
    %c29 = arith.constant 29 : index
    %476 = memref.load %arg1[%c29] : memref<32xf32, #tpu.memory_space<smem>>
    %477 = vector.broadcast %476 : f32 to vector<8x128xf32>
    %478 = arith.mulf %477, %9 : vector<8x128xf32>
    %c29_94 = arith.constant 29 : index
    %479 = memref.load %arg2[%c29_94] : memref<32xf32, #tpu.memory_space<smem>>
    %480 = vector.broadcast %479 : f32 to vector<8x128xf32>
    %481 = arith.addf %478, %480 : vector<8x128xf32>
    %482 = math.tanh %481 : vector<8x128xf32>
    %c29_95 = arith.constant 29 : index
    %483 = memref.load %arg3[%c29_95] : memref<32xf32, #tpu.memory_space<smem>>
    %484 = vector.broadcast %483 : f32 to vector<8x128xf32>
    %485 = arith.mulf %484, %482 : vector<8x128xf32>
    %486 = arith.addf %470, %485 : vector<8x128xf32>
    %c29_96 = arith.constant 29 : index
    %487 = memref.load %arg4[%c29_96] : memref<32xf32, #tpu.memory_space<smem>>
    %488 = arith.mulf %482, %482 : vector<8x128xf32>
    %489 = vector.broadcast %487 : f32 to vector<8x128xf32>
    %490 = arith.mulf %489, %488 : vector<8x128xf32>
    %491 = arith.addf %475, %490 : vector<8x128xf32>
    %c30 = arith.constant 30 : index
    %492 = memref.load %arg1[%c30] : memref<32xf32, #tpu.memory_space<smem>>
    %493 = vector.broadcast %492 : f32 to vector<8x128xf32>
    %494 = arith.mulf %493, %9 : vector<8x128xf32>
    %c30_97 = arith.constant 30 : index
    %495 = memref.load %arg2[%c30_97] : memref<32xf32, #tpu.memory_space<smem>>
    %496 = vector.broadcast %495 : f32 to vector<8x128xf32>
    %497 = arith.addf %494, %496 : vector<8x128xf32>
    %498 = math.tanh %497 : vector<8x128xf32>
    %c30_98 = arith.constant 30 : index
    %499 = memref.load %arg3[%c30_98] : memref<32xf32, #tpu.memory_space<smem>>
    %500 = vector.broadcast %499 : f32 to vector<8x128xf32>
    %501 = arith.mulf %500, %498 : vector<8x128xf32>
    %502 = arith.addf %486, %501 : vector<8x128xf32>
    %c30_99 = arith.constant 30 : index
    %503 = memref.load %arg4[%c30_99] : memref<32xf32, #tpu.memory_space<smem>>
    %504 = arith.mulf %498, %498 : vector<8x128xf32>
    %505 = vector.broadcast %503 : f32 to vector<8x128xf32>
    %506 = arith.mulf %505, %504 : vector<8x128xf32>
    %507 = arith.addf %491, %506 : vector<8x128xf32>
    %c31 = arith.constant 31 : index
    %508 = memref.load %arg1[%c31] : memref<32xf32, #tpu.memory_space<smem>>
    %509 = vector.broadcast %508 : f32 to vector<8x128xf32>
    %510 = arith.mulf %509, %9 : vector<8x128xf32>
    %c31_100 = arith.constant 31 : index
    %511 = memref.load %arg2[%c31_100] : memref<32xf32, #tpu.memory_space<smem>>
    %512 = vector.broadcast %511 : f32 to vector<8x128xf32>
    %513 = arith.addf %510, %512 : vector<8x128xf32>
    %514 = math.tanh %513 : vector<8x128xf32>
    %c31_101 = arith.constant 31 : index
    %515 = memref.load %arg3[%c31_101] : memref<32xf32, #tpu.memory_space<smem>>
    %516 = vector.broadcast %515 : f32 to vector<8x128xf32>
    %517 = arith.mulf %516, %514 : vector<8x128xf32>
    %518 = arith.addf %502, %517 : vector<8x128xf32>
    %c31_102 = arith.constant 31 : index
    %519 = memref.load %arg4[%c31_102] : memref<32xf32, #tpu.memory_space<smem>>
    %520 = arith.mulf %514, %514 : vector<8x128xf32>
    %521 = vector.broadcast %519 : f32 to vector<8x128xf32>
    %522 = arith.mulf %521, %520 : vector<8x128xf32>
    %523 = arith.addf %507, %522 : vector<8x128xf32>
    %524 = vector.broadcast %3 : f32 to vector<8x128xf32>
    %525 = arith.subf %524, %523 : vector<8x128xf32>
    %526 = arith.mulf %525, %525 : vector<8x128xf32>
    %cst_103 = arith.constant 1.000000e+00 : f32
    %527 = vector.broadcast %cst_103 : f32 to vector<8x128xf32>
    %528 = arith.addf %527, %526 : vector<8x128xf32>
    %529 = vector.broadcast %0 : f32 to vector<8x128xf32>
    %530 = arith.addf %518, %529 : vector<8x128xf32>
    %531 = vector.broadcast %1 : f32 to vector<8x128xf32>
    %532 = arith.mulf %531, %530 : vector<8x128xf32>
    %533 = vector.broadcast %2 : f32 to vector<8x128xf32>
    %534 = arith.addf %532, %533 : vector<8x128xf32>
    %535 = arith.mulf %528, %534 : vector<8x128xf32>
    %536 = math.rsqrt %535 : vector<8x128xf32>
    %537 = arith.mulf %528, %536 : vector<8x128xf32>
    %538 = arith.index_cast %7 : i32 to index
    %c0_104 = arith.constant 0 : index
    %539 = vector.load %arg7[%538, %c0_104] : memref<8x128xf32, #tpu.memory_space<vmem>>, vector<8x128xf32>
    tpu.vector_store %arg7[%538, %c0_104], %537 {strides = array<i32>} : memref<8x128xf32, #tpu.memory_space<vmem>>, vector<8x128xf32>,
    %c1_i32_105 = arith.constant 1 : i32
    return
  }
  func.func @transform_0(%arg0: i32) -> i32 {
    %c0_i32 = arith.constant 0 : i32
    %c0_i32_0 = arith.constant 0 : i32
    return %c0_i32 : i32
  }
  func.func @transform_1(%arg0: i32) -> i32 {
    %c0_i32 = arith.constant 0 : i32
    %c0_i32_0 = arith.constant 0 : i32
    return %c0_i32 : i32
  }
  func.func @transform_2(%arg0: i32) -> i32 {
    %c0_i32 = arith.constant 0 : i32
    %c0_i32_0 = arith.constant 0 : i32
    return %c0_i32 : i32
  }
  func.func @transform_3(%arg0: i32) -> i32 {
    %c0_i32 = arith.constant 0 : i32
    %c0_i32_0 = arith.constant 0 : i32
    return %c0_i32 : i32
  }
  func.func @transform_4(%arg0: i32) -> i32 {
    %c0_i32 = arith.constant 0 : i32
    %c0_i32_0 = arith.constant 0 : i32
    return %c0_i32 : i32
  }
  func.func @transform_5(%arg0: i32) -> (i32, i32) {
    %c0_i32 = arith.constant 0 : i32
    %c0_i32_0 = arith.constant 0 : i32
    return %arg0, %c0_i32 : i32, i32
  }
  func.func @transform_6(%arg0: i32) -> (i32, i32) {
    %c0_i32 = arith.constant 0 : i32
    %c0_i32_0 = arith.constant 0 : i32
    return %arg0, %c0_i32 : i32, i32
  }
}

</mosaic_0001>

<bundles_post_ra>
// kernel: tpu_custom_call.1
= control target key start
LH: loop header
LB: loop body
LE: loop exit
PB: predicated region body
PF: predicated region fallthrough
CT: control target
= control target key end

     0   :  { %11 = vsyncpa [#allocation4], 0  ;;  %s1403_s0 = inlined_call_operand.hbm [shape: f32[32], index: 0, kind: input, shape index: {}]   ;;  %s1404_s1 = inlined_call_operand.vmem [shape: f32[32], index: 1, kind: input, shape index: {}]   ;;  %s1405_s2 = inlined_call_operand.vmem [shape: f32[32], index: 2, kind: input, shape index: {}]   ;;  %s1406_s3 = inlined_call_operand.vmem [shape: f32[32], index: 3, kind: input, shape index: {}]   ;;  %s1407_s4 = inlined_call_operand.vmem [shape: f32[4], index: 4, kind: input, shape index: {}]   ;;  %s1408_s5 = inlined_call_operand.vmem [shape: f32[8,128], index: 5, kind: input, shape index: {}]   ;;  %s1409_s6 = inlined_call_operand.hbm [shape: f32[8,128], index: 6, kind: output, shape index: {}]  }
   0x1   :  { %12 = vsyncpa [#allocation5], 0 }
   0x2   :  { %13 = vsyncpa [#allocation8], 0 }
   0x3   :  { %14 = vsyncpa [#allocation11], 0  ;;  %s40_s23 = sshll.u32 %s1405_s2, 4  ;;  %s41_s23 = int_to_ptr.vmem [resolvable:$true] %s40_s23 }
   0x4   :  { %15 = vsyncpa [#allocation3], 0  ;;  %s830_s24 = scalar_lea.vmem %s41_s23, 16  ;;  %p835_p1 = scmp.lt.s32.totalorder %s41_s23, %s41_s23 }
   0x5   :  { %p831_p0 = scmp.ne.s32.totalorder %s41_s23, %s830_s24  ;;  %p836_p2 = scmp.lt.s32.totalorder %s830_s24, %s830_s24 }
   0x7   :  { %p837_p3 = por %p836_p2, %p835_p1 }
   0x9   :  { %p838_p4 = pnand %p837_p3, %p831_p0 }
   0xb   :  { %841 = shalt.err (!%p838_p4)
}
   0xc   :  { %s920_s25 = smov [#allocation7]   ;;  %s842_s28 = scalar_lea.hbm %s1403_s0, 16 }
   0xd   :  { %43 = dma.vmem_to_smem %s41_s23, 16, %s920_s25, [#allocation8]  }
   0xe   :  { %p843_p5 = scmp.ne.s32.totalorder %s1403_s0, %s842_s28  ;;  %p846_p6 = scmp.lt.u32.totalorder %s842_s28, %s1403_s0 }
  0x10   :  { %p848_p7 = pnand %p846_p6, %p843_p5 }
  0x12   :  { %851 = shalt.err (!%p848_p7)
}
  0x13   :  { %s921_s8 = smov [#allocation2]   ;;  %s30_s13 = sshll.u32 %s1404_s1, 4  ;;  %s31_s13 = int_to_ptr.vmem [resolvable:$true] %s30_s13 }
  0x14   :  { %23 = dma.hbm_to_smem %s1403_s0, 16, %s921_s8, [#allocation4]  }
  0x15   :  { %s50_s16 = sshll.u32 %s1406_s3, 4  ;;  %s852_s17 = scalar_lea.vmem %s31_s13, 16  ;;  %s51_s16 = int_to_ptr.vmem [resolvable:$true] %s50_s16 }
  0x16   :  { %p853_p8 = scmp.ne.s32.totalorder %s31_s13, %s852_s17  ;;  %p857_p9 = scmp.lt.s32.totalorder %s31_s13, %s31_s13 }
  0x17   :  { %p858_p10 = scmp.lt.s32.totalorder %s852_s17, %s852_s17 }
  0x19   :  { %p859_p11 = por %p858_p10, %p857_p9 }
  0x1b   :  { %p860_p12 = pnand %p859_p11, %p853_p8 }
  0x1d   :  { %863 = shalt.err (!%p860_p12)
}
  0x1e   :  { %s922_s18 = smov [#allocation6]   ;;  %s864_s0 = scalar_lea.vmem %s51_s16, 16 }
  0x1f   :  { %33 = dma.vmem_to_smem %s31_s13, 16, %s922_s18, [#allocation5]  }
  0x20   :  { %p865_p13 = scmp.ne.s32.totalorder %s51_s16, %s864_s0  ;;  %p869_p0 = scmp.lt.s32.totalorder %s51_s16, %s51_s16 }
  0x21   :  { %p870_p1 = scmp.lt.s32.totalorder %s864_s0, %s864_s0 }
  0x23   :  { %p871_p2 = por %p870_p1, %p869_p0 }
  0x25   :  { %p872_p3 = pnand %p871_p2, %p865_p13 }
  0x27   :  { %875 = shalt.err (!%p872_p3)
}
  0x28   :  { %s923_s1 = smov [#allocation9]   ;;  %s60_s20 = sshll.u32 %s1407_s4, 4  ;;  %s61_s20 = int_to_ptr.vmem [resolvable:$true] %s60_s20 }
  0x29   :  { %53 = dma.vmem_to_smem %s51_s16, 16, %s923_s1, [#allocation8]  }
  0x2a   :  { %s876_s21 = scalar_lea.vmem %s61_s20, 16  ;;  %p881_p5 = scmp.lt.s32.totalorder %s61_s20, %s61_s20 }
  0x2b   :  { %p877_p4 = scmp.ne.s32.totalorder %s61_s20, %s876_s21  ;;  %p882_p6 = scmp.lt.s32.totalorder %s876_s21, %s876_s21 }
  0x2d   :  { %p883_p7 = por %p882_p6, %p881_p5 }
  0x2f   :  { %p884_p8 = pnand %p883_p7, %p877_p4 }
  0x31   :  { %887 = shalt.err (!%p884_p8)
}
  0x32   :  { %s924_s22 = smov [#allocation10]  }
  0x33   :  { %63 = dma.vmem_to_smem %s61_s20, 16, %s924_s22, [#allocation11]  }
  0x34   :  { %910 = dma.done.wait [#allocation4], 16  }
  0x35   :  { %911 = vsyncadd [#allocation4], 4294967280 }
  0x36   :  { %912 = dma.done.wait [#allocation5], 16  }
  0x37   :  { %913 = vsyncadd [#allocation5], 4294967280 }
  0x38   :  { %914 = dma.done.wait [#allocation8], 32  }
  0x39   :  { %915 = vsyncadd [#allocation8], 4294967264 }
  0x3a   :  { %916 = dma.done.wait [#allocation11], 16  }
  0x3b   :  { %917 = vsyncadd [#allocation11], 4294967280 }
  0x3c   :  { %81 = sfence }
  0x3d   :  { %s87_s4 = sld [smem:[#allocation2]]  ;;  %s634_s24 = sld [smem:[#allocation2 + $0x1]]  ;;  %v990_v0 = vld [vmem:[%s1408_s5] sm:$0xff] }
  0x3e   :  { %s90_s23 = sld [smem:[#allocation6]]  ;;  %s635_s25 = sld [smem:[#allocation6 + $0x1]] }
  0x3f   :  { %s985_s26 = sld [smem:[#allocation7]]  ;;  %s638_s29 = sld [smem:[#allocation2 + $0x2]] }
  0x40   :  { %s992_s30 = sld [smem:[#allocation6 + $0x2]]  ;;  %s994_s2 = sld [smem:[#allocation9]] }
  0x41   :  { %s996_s7 = sld [smem:[#allocation7 + $0x1]]  ;;  %s642_s8 = sld [smem:[#allocation2 + $0x3]] }
  0x42   :  { %s998_s9 = sld [smem:[#allocation6 + $0x3]]  ;;  %s1001_s10 = sld [smem:[#allocation9 + $0x1]] }
  0x43   :  { %v88_v1 = vstv %s87_s4  ;;  %s1003_s11 = sld [smem:[#allocation7 + $0x2]]  ;;  %v104_v4 = vstv %s634_s24  ;;  %s1005_s5 = sld [smem:[#allocation2 + $0x4]] }
  0x44   :  { %v91_v2 = vstv %s90_s23  ;;  %v89_v3 = vmul.f32 %v88_v1, %v990_v0  ;;  %v107_v5 = vstv %s635_s25  ;;  %s1007_s12 = sld [smem:[#allocation6 + $0x4]]  ;;  %v105_v7 = vmul.f32 %v104_v4, %v990_v0  ;;  %s1010_s13 = sld [smem:[#allocation9 + $0x2]] }
  0x45   :  { %s1012_s14 = sld [smem:[#allocation7 + $0x3]]  ;;  %v120_v8 = vstv %s638_s29  ;;  %s1015_s15 = sld [smem:[#allocation2 + $0x5]]  ;;  %v95_v18 = vstv %s985_s26 }
  0x46   :  { %v92_v6 = vadd.f32 %v91_v2, %v89_v3  ;;  %v123_v9 = vstv %s992_s30  ;;  %s1017_s16 = sld [smem:[#allocation6 + $0x5]]  ;;  %v108_v10 = vadd.f32 %v107_v5, %v105_v7  ;;  %v121_v11 = vmul.f32 %v120_v8, %v990_v0  ;;  %s1020_s17 = sld [smem:[#allocation9 + $0x3]] }
  0x47   :  { %s1022_s18 = sld [smem:[#allocation7 + $0x4]]  ;;  %v136_v12 = vstv %s642_s8  ;;  %s1025_s0 = sld [smem:[#allocation2 + $0x6]]  ;;  %v100_v21 = vstv %s994_s2  ;;  %v111_v22 = vstv %s996_s7 }
  0x48   :  { %764 = vtanh.f32 %v92_v6  ;;  %v139_v13 = vstv %s998_s9  ;;  %s1027_s1 = sld [smem:[#allocation6 + $0x6]]  ;;  %v124_v14 = vadd.f32 %v123_v9, %v121_v11  ;;  %v137_v15 = vmul.f32 %v136_v12, %v990_v0  ;;  %s1030_s3 = sld [smem:[#allocation9 + $0x4]] }
  0x49   :  { %766 = vtanh.f32 %v108_v10  ;;  %s1032_s19 = sld [smem:[#allocation7 + $0x5]]  ;;  %v152_v16 = vstv %s1005_s5  ;;  %s1036_s20 = sld [smem:[#allocation2 + $0x7]]  ;;  %v116_v25 = vstv %s1001_s10  ;;  %v127_v28 = vstv %s1003_s11 }
  0x4a   :  { %v155_v17 = vstv %s1007_s12  ;;  %s1038_s21 = sld [smem:[#allocation6 + $0x7]]  ;;  %768 = vtanh.f32 %v124_v14  ;;  %v140_v19 = vadd.f32 %v139_v13, %v137_v15  ;;  %v153_v20 = vmul.f32 %v152_v16, %v990_v0  ;;  %s1042_s22 = sld [smem:[#allocation9 + $0x5]] }
  0x4b   :  { %v168_v23 = vstv %s1015_s15  ;;  %s1048_s4 = sld [smem:[#allocation2 + $0x8]]  ;;  %s1054_s24 = sld [smem:[#allocation7 + $0x6]]  ;;  %v132_v29 = vstv %s1010_s13  ;;  %v143_v32 = vstv %s1012_s14 }
  0x4c   :  { %v171_v24 = vstv %s1017_s16  ;;  %s1050_s23 = sld [smem:[#allocation6 + $0x8]]  ;;  %770 = vtanh.f32 %v140_v19  ;;  %v156_v26 = vadd.f32 %v155_v17, %v153_v20  ;;  %v169_v27 = vmul.f32 %v168_v23, %v990_v0  ;;  %s1060_s25 = sld [smem:[#allocation2 + $0x9]] }
  0x4d   :  { %v184_v30 = vstv %s1025_s0  ;;  %s1064_s26 = sld [smem:[#allocation9 + $0x6]]  ;;  %s1066_s27 = sld [smem:[#allocation6 + $0x9]]  ;;  %v148_v35 = vstv %s1020_s17  ;;  %v159_v36 = vstv %s1022_s18 }
  0x4e   :  { %v187_v31 = vstv %s1027_s1  ;;  %772 = vtanh.f32 %v156_v26  ;;  %v172_v33 = vadd.f32 %v171_v24, %v169_v27  ;;  %v185_v34 = vmul.f32 %v184_v30, %v990_v0  ;;  %s1074_s28 = sld [smem:[#allocation7 + $0x7]]  ;;  %s1076_s29 = sld [smem:[#allocation2 + $0xa]] }
  0x4f   :  { %v200_v37 = vstv %s1036_s20  ;;  %v164_v40 = vstv %s1030_s3  ;;  %v175_v45 = vstv %s1032_s19  ;;  %s1082_s30 = sld [smem:[#allocation6 + $0xa]]  ;;  %s1086_s2 = sld [smem:[#allocation9 + $0x7]] }
  0x50   :  { %v203_v38 = vstv %s1038_s21  ;;  %774 = vtanh.f32 %v172_v33  ;;  %v188_v41 = vadd.f32 %v187_v31, %v185_v34  ;;  %v201_v42 = vmul.f32 %v200_v37, %v990_v0  ;;  %s1088_s7 = sld [smem:[#allocation7 + $0x8]]  ;;  %s1094_s8 = sld [smem:[#allocation2 + $0xb]] }
  0x51   :  { %v216_v46 = vstv %s1048_s4  ;;  %v180_v54 = vstv %s1042_s22  ;;  %v191_v56 = vstv %s1054_s24  ;;  %s1096_s9 = sld [smem:[#allocation6 + $0xb]]  ;;  %s1099_s10 = sld [smem:[#allocation9 + $0x8]] }
  0x52   :  { %v765_v39 = vpop.eup %764  ;;  %776 = vtanh.f32 %v188_v41  ;;  %v204_v48 = vadd.f32 %v203_v38, %v201_v42  ;;  %v217_v49 = vmul.f32 %v216_v46, %v990_v0  ;;  %v219_v50 = vstv %s1050_s23  ;;  %s1101_s11 = sld [smem:[#allocation7 + $0x9]]  ;;  %s1106_s5 = sld [smem:[#allocation2 + $0xc]] }
  0x53   :  { %v96_v43 = vmul.f32 %v765_v39, %v95_v18  ;;  %v99_v44 = vmul.f32 %v765_v39, %v765_v39  ;;  %v767_v47 = vpop.eup %766  ;;  %v232_v58 = vstv %s1060_s25  ;;  %v196_v1 = vstv %s1064_s26  ;;  %s1108_s12 = sld [smem:[#allocation6 + $0xc]]  ;;  %s1110_s13 = sld [smem:[#allocation9 + $0x9]] }
  0x54   :  { %v112_v52 = vmul.f32 %v767_v47, %v111_v22  ;;  %v115_v53 = vmul.f32 %v767_v47, %v767_v47  ;;  %v769_v55 = vpop.eup %768  ;;  %778 = vtanh.f32 %v204_v48  ;;  %v220_v57 = vadd.f32 %v219_v50, %v217_v49  ;;  %s1114_s14 = sld [smem:[#allocation2 + $0xd]]  ;;  %s1116_s15 = sld [smem:[#allocation7 + $0xa]] }
  0x55   :  { %v101_v51 = vmul.f32 %v100_v21, %v99_v44  ;;  %v128_v61 = vmul.f32 %v769_v55, %v127_v28  ;;  %v131_v62 = vmul.f32 %v769_v55, %v769_v55  ;;  %v233_v2 = vmul.f32 %v232_v58, %v990_v0  ;;  %s1120_s16 = sld [smem:[#allocation6 + $0xd]]  ;;  %s1122_s17 = sld [smem:[#allocation9 + $0xa]] }
  0x56   :  { %v113_v59 = vadd.f32 %v112_v52, %v96_v43  ;;  %v117_v60 = vmul.f32 %v116_v25, %v115_v53  ;;  %v771_v63 = vpop.eup %770  ;;  %780 = vtanh.f32 %v220_v57  ;;  %v235_v3 = vstv %s1066_s27  ;;  %s1124_s18 = sld [smem:[#allocation7 + $0xb]]  ;;  %s1131_s1 = sld [smem:[#allocation2 + $0xe]] }
  0x57   :  { %v133_v6 = vmul.f32 %v132_v29, %v131_v62  ;;  %v144_v7 = vmul.f32 %v771_v63, %v143_v32  ;;  %v147_v9 = vmul.f32 %v771_v63, %v771_v63  ;;  %v207_v10 = vstv %s1074_s28  ;;  %s1129_s0 = sld [smem:[#allocation9 + $0xb]]  ;;  %s1133_s3 = sld [smem:[#allocation7 + $0xc]] }
  0x58   :  { %v118_v4 = vadd.f32 %v117_v60, %v101_v51  ;;  %v129_v5 = vadd.f32 %v128_v61, %v113_v59  ;;  %v773_v8 = vpop.eup %772  ;;  %v236_v11 = vadd.f32 %v235_v3, %v233_v2  ;;  %v248_v12 = vstv %s1076_s29  ;;  %s1135_s19 = sld [smem:[#allocation6 + $0xe]]  ;;  %s1139_s20 = sld [smem:[#allocation2 + $0xf]] }
  0x59   :  { %v160_v15 = vmul.f32 %v773_v8, %v159_v36  ;;  %v163_v16 = vmul.f32 %v773_v8, %v773_v8  ;;  %v149_v18 = vmul.f32 %v148_v35, %v147_v9  ;;  %v249_v19 = vmul.f32 %v248_v12, %v990_v0  ;;  %s1141_s21 = sld [smem:[#allocation6 + $0xf]]  ;;  %s1145_s22 = sld [smem:[#allocation9 + $0xc]] }
  0x5a   :  { %v134_v13 = vadd.f32 %v133_v6, %v118_v4  ;;  %v145_v14 = vadd.f32 %v144_v7, %v129_v5  ;;  %v775_v17 = vpop.eup %774  ;;  %782 = vtanh.f32 %v236_v11  ;;  %v251_v20 = vstv %s1082_s30  ;;  %s1147_s4 = sld [smem:[#allocation7 + $0xd]]  ;;  %s1150_s23 = sld [smem:[#allocation2 + $0x10]] }
  0x5b   :  { %v165_v22 = vmul.f32 %v164_v40, %v163_v16  ;;  %v176_v23 = vmul.f32 %v775_v17, %v175_v45  ;;  %v179_v24 = vmul.f32 %v775_v17, %v775_v17  ;;  %v212_v27 = vstv %s1086_s2  ;;  %s1152_s24 = sld [smem:[#allocation6 + $0x10]]  ;;  %s1155_s25 = sld [smem:[#allocation9 + $0xd]] }
  0x5c   :  { %v161_v21 = vadd.f32 %v160_v15, %v145_v14  ;;  %v777_v25 = vpop.eup %776  ;;  %v150_v26 = vadd.f32 %v149_v18, %v134_v13  ;;  %v223_v28 = vstv %s1088_s7  ;;  %v252_v29 = vadd.f32 %v251_v20, %v249_v19  ;;  %s1159_s26 = sld [smem:[#allocation2 + $0x11]]  ;;  %s1164_s28 = sld [smem:[#allocation7 + $0xe]] }
  0x5d   :  { %v181_v31 = vmul.f32 %v180_v54, %v179_v24  ;;  %v192_v32 = vmul.f32 %v777_v25, %v191_v56  ;;  %v195_v33 = vmul.f32 %v777_v25, %v777_v25  ;;  %v264_v36 = vstv %s1094_s8  ;;  %s1161_s27 = sld [smem:[#allocation6 + $0x11]]  ;;  %s1169_s29 = sld [smem:[#allocation2 + $0x12]] }
  0x5e   :  { %v177_v30 = vadd.f32 %v176_v23, %v161_v21  ;;  %v779_v34 = vpop.eup %778  ;;  %v166_v35 = vadd.f32 %v165_v22, %v150_v26  ;;  %784 = vtanh.f32 %v252_v29  ;;  %v267_v37 = vstv %s1096_s9  ;;  %s1171_s30 = sld [smem:[#allocation6 + $0x12]]  ;;  %s1175_s2 = sld [smem:[#allocation9 + $0xe]] }
  0x5f   :  { %v197_v39 = vmul.f32 %v196_v1, %v195_v33  ;;  %v208_v40 = vmul.f32 %v779_v34, %v207_v10  ;;  %v211_v41 = vmul.f32 %v779_v34, %v779_v34  ;;  %v228_v44 = vstv %s1099_s10  ;;  %s1182_s7 = sld [smem:[#allocation7 + $0xf]]  ;;  %s1184_s8 = sld [smem:[#allocation2 + $0x13]] }
  0x60   :  { %v193_v38 = vadd.f32 %v192_v32, %v177_v30  ;;  %v781_v42 = vpop.eup %780  ;;  %v182_v43 = vadd.f32 %v181_v31, %v166_v35  ;;  %v239_v45 = vstv %s1101_s11  ;;  %v265_v46 = vmul.f32 %v264_v36, %v990_v0  ;;  %s1190_s9 = sld [smem:[#allocation9 + $0xf]]  ;;  %s1193_s10 = sld [smem:[#allocation6 + $0x13]] }
  0x61   :  { %v213_v48 = vmul.f32 %v212_v27, %v211_v41  ;;  %v224_v49 = vmul.f32 %v781_v42, %v223_v28  ;;  %v227_v50 = vmul.f32 %v781_v42, %v781_v42  ;;  %v280_v53 = vstv %s1106_s5  ;;  %s1195_s11 = sld [smem:[#allocation7 + $0x10]]  ;;  %s1199_s5 = sld [smem:[#allocation2 + $0x14]] }
  0x62   :  { %v209_v47 = vadd.f32 %v208_v40, %v193_v38  ;;  %v198_v51 = vadd.f32 %v197_v39, %v182_v43  ;;  %v268_v52 = vadd.f32 %v267_v37, %v265_v46  ;;  %v283_v54 = vstv %s1108_s12  ;;  %s1201_s12 = sld [smem:[#allocation6 + $0x14]] }
  0x63   :  { %v229_v55 = vmul.f32 %v228_v44, %v227_v50  ;;  %v244_v56 = vstv %s1110_s13  ;;  %v281_v57 = vmul.f32 %v280_v53, %v990_v0  ;;  %v296_v61 = vstv %s1114_s14  ;;  %s1204_s13 = sld [smem:[#allocation9 + $0x10]]  ;;  %s1207_s14 = sld [smem:[#allocation7 + $0x11]] }
  0x64   :  { %v783_v58 = vpop.eup %782  ;;  %v214_v59 = vadd.f32 %v213_v48, %v198_v51  ;;  %v225_v60 = vadd.f32 %v224_v49, %v209_v47  ;;  %786 = vtanh.f32 %v268_v52  ;;  %v297_v2 = vmul.f32 %v296_v61, %v990_v0 }
  0x65   :  { %v240_v62 = vmul.f32 %v783_v58, %v239_v45  ;;  %v243_v63 = vmul.f32 %v783_v58, %v783_v58  ;;  %v284_v1 = vadd.f32 %v283_v54, %v281_v57  ;;  %v255_v4 = vstv %s1116_s15  ;;  %s1212_s15 = sld [smem:[#allocation2 + $0x15]] }
  0x66   :  { %v230_v3 = vadd.f32 %v229_v55, %v214_v59  ;;  %v299_v5 = vstv %s1120_s16  ;;  %v260_v7 = vstv %s1122_s17  ;;  %v271_v11 = vstv %s1124_s18  ;;  %s1216_s16 = sld [smem:[#allocation9 + $0x11]]  ;;  %s1219_s17 = sld [smem:[#allocation6 + $0x15]] }
  0x67   :  { %v245_v6 = vmul.f32 %v244_v56, %v243_v63  ;;  %788 = vtanh.f32 %v284_v1  ;;  %v300_v8 = vadd.f32 %v299_v5, %v297_v2  ;;  %v241_v10 = vadd.f32 %v240_v62, %v225_v60  ;;  %s1222_s18 = sld [smem:[#allocation7 + $0x12]] }
  0x68   :  { %v785_v9 = vpop.eup %784  ;;  %v276_v12 = vstv %s1129_s0  ;;  %v312_v13 = vstv %s1131_s1  ;;  %v315_v16 = vstv %s1135_s19  ;;  %v328_v19 = vstv %s1139_s20  ;;  %s1224_s0 = sld [smem:[#allocation9 + $0x12]]  ;;  %s1229_s1 = sld [smem:[#allocation2 + $0x16]] }
  0x69   :  { %v256_v14 = vmul.f32 %v785_v9, %v255_v4  ;;  %v259_v15 = vmul.f32 %v785_v9, %v785_v9  ;;  %790 = vtanh.f32 %v300_v8  ;;  %v246_v17 = vadd.f32 %v245_v6, %v230_v3  ;;  %s1237_s19 = sld [smem:[#allocation7 + $0x13]]  ;;  %s1240_s20 = sld [smem:[#allocation2 + $0x17]] }
  0x6a   :  { %v313_v18 = vmul.f32 %v312_v13, %v990_v0  ;;  %v331_v20 = vstv %s1141_s21  ;;  %v287_v22 = vstv %s1133_s3  ;;  %v292_v23 = vstv %s1145_s22  ;;  %s1231_s3 = sld [smem:[#allocation6 + $0x16]]  ;;  %s1244_s21 = sld [smem:[#allocation6 + $0x17]] }
  0x6b   :  { %v261_v21 = vmul.f32 %v260_v7, %v259_v15  ;;  %v329_v24 = vmul.f32 %v328_v19, %v990_v0  ;;  %v303_v25 = vstv %s1147_s4  ;;  %v344_v27 = vstv %s1150_s23  ;;  %s1247_s22 = sld [smem:[#allocation9 + $0x13]]  ;;  %s1249_s4 = sld [smem:[#allocation7 + $0x14]] }
  0x6c   :  { %v316_v26 = vadd.f32 %v315_v16, %v313_v18  ;;  %v347_v28 = vstv %s1152_s24  ;;  %v257_v29 = vadd.f32 %v256_v14, %v241_v10  ;;  %v308_v30 = vstv %s1155_s25  ;;  %s1252_s23 = sld [smem:[#allocation9 + $0x14]]  ;;  %s1255_s24 = sld [smem:[#allocation2 + $0x18]] }
  0x6d   :  { %v332_v31 = vadd.f32 %v331_v20, %v329_v24  ;;  %v345_v32 = vmul.f32 %v344_v27, %v990_v0  ;;  %v262_v34 = vadd.f32 %v261_v21, %v246_v17  ;;  %v360_v35 = vstv %s1159_s26  ;;  %s1257_s25 = sld [smem:[#allocation6 + $0x18]]  ;;  %s1262_s26 = sld [smem:[#allocation7 + $0x15]] }
  0x6e   :  { %v787_v33 = vpop.eup %786  ;;  %792 = vtanh.f32 %v316_v26  ;;  %v363_v36 = vstv %s1161_s27  ;;  %v319_v40 = vstv %s1164_s28  ;;  %v361_v41 = vmul.f32 %v360_v35, %v990_v0  ;;  %s1267_s27 = sld [smem:[#allocation2 + $0x19]] }
  0x6f   :  { %v272_v37 = vmul.f32 %v787_v33, %v271_v11  ;;  %v275_v38 = vmul.f32 %v787_v33, %v787_v33  ;;  %794 = vtanh.f32 %v332_v31  ;;  %v348_v39 = vadd.f32 %v347_v28, %v345_v32  ;;  %s1269_s28 = sld [smem:[#allocation6 + $0x19]] }
  0x70   :  { %v376_v42 = vstv %s1169_s29  ;;  %v379_v43 = vstv %s1171_s30  ;;  %v324_v50 = vstv %s1175_s2  ;;  %v364_v51 = vadd.f32 %v363_v36, %v361_v41  ;;  %s1271_s29 = sld [smem:[#allocation9 + $0x15]]  ;;  %s1273_s30 = sld [smem:[#allocation7 + $0x16]] }
  0x71   :  { %v789_v44 = vpop.eup %788  ;;  %v273_v45 = vadd.f32 %v272_v37, %v257_v29  ;;  %v277_v46 = vmul.f32 %v276_v12, %v275_v38  ;;  %796 = vtanh.f32 %v348_v39  ;;  %v377_v47 = vmul.f32 %v376_v42, %v990_v0  ;;  %s1279_s2 = sld [smem:[#allocation2 + $0x1a]] }
  0x72   :  { %v288_v48 = vmul.f32 %v789_v44, %v287_v22  ;;  %v291_v49 = vmul.f32 %v789_v44, %v789_v44  ;;  %v335_v54 = vstv %s1182_s7  ;;  %v392_v56 = vstv %s1184_s8  ;;  %s1281_s7 = sld [smem:[#allocation6 + $0x1a]]  ;;  %s1283_s8 = sld [smem:[#allocation9 + $0x16]] }
  0x73   :  { %v791_v52 = vpop.eup %790  ;;  %v278_v53 = vadd.f32 %v277_v46, %v262_v34  ;;  %v380_v55 = vadd.f32 %v379_v43, %v377_v47  ;;  %v340_v61 = vstv %s1190_s9  ;;  %798 = vtanh.f32 %v364_v51  ;;  %s1288_s9 = sld [smem:[#allocation2 + $0x1b]] }
  0x74   :  { %v289_v57 = vadd.f32 %v288_v48, %v273_v45  ;;  %v293_v58 = vmul.f32 %v292_v23, %v291_v49  ;;  %v304_v59 = vmul.f32 %v791_v52, %v303_v25  ;;  %v307_v60 = vmul.f32 %v791_v52, %v791_v52 }
  0x75   :  { %v393_v62 = vmul.f32 %v392_v56, %v990_v0  ;;  %v395_v63 = vstv %s1193_s10  ;;  %v351_v3 = vstv %s1195_s11  ;;  %800 = vtanh.f32 %v380_v55  ;;  %s1290_s10 = sld [smem:[#allocation6 + $0x1b]]  ;;  %s1294_s11 = sld [smem:[#allocation7 + $0x17]] }
  0x76   :  { %v294_v1 = vadd.f32 %v293_v58, %v278_v53  ;;  %v309_v2 = vmul.f32 %v308_v30, %v307_v60  ;;  %v305_v4 = vadd.f32 %v304_v59, %v289_v57  ;;  %v408_v6 = vstv %s1199_s5  ;;  %s1296_s5 = sld [smem:[#allocation2 + $0x1c]] }
  0x77   :  { %v396_v5 = vadd.f32 %v395_v63, %v393_v62  ;;  %v411_v7 = vstv %s1201_s12  ;;  %v356_v10 = vstv %s1204_s13  ;;  %v367_v11 = vstv %s1207_s14  ;;  %s1298_s12 = sld [smem:[#allocation9 + $0x17]]  ;;  %s1303_s13 = sld [smem:[#allocation7 + $0x18]] }
  0x78   :  { %v793_v8 = vpop.eup %792  ;;  %v310_v9 = vadd.f32 %v309_v2, %v294_v1  ;;  %v409_v12 = vmul.f32 %v408_v6, %v990_v0  ;;  %v424_v16 = vstv %s1212_s15  ;;  %v372_v24 = vstv %s1216_s16  ;;  %s1306_s14 = sld [smem:[#allocation6 + $0x1c]]  ;;  %s1309_s15 = sld [smem:[#allocation9 + $0x18]] }
  0x79   :  { %v795_v13 = vpop.eup %794  ;;  %v320_v14 = vmul.f32 %v793_v8, %v319_v40  ;;  %v323_v15 = vmul.f32 %v793_v8, %v793_v8  ;;  %802 = vtanh.f32 %v396_v5  ;;  %v425_v20 = vmul.f32 %v424_v16, %v990_v0  ;;  %s1313_s16 = sld [smem:[#allocation2 + $0x1d]] }
  0x7a   :  { %v336_v17 = vmul.f32 %v795_v13, %v335_v54  ;;  %v339_v18 = vmul.f32 %v795_v13, %v795_v13  ;;  %v412_v19 = vadd.f32 %v411_v7, %v409_v12  ;;  %v427_v25 = vstv %s1219_s17  ;;  %s1315_s17 = sld [smem:[#allocation6 + $0x1d]] }
  0x7b   :  { %v797_v21 = vpop.eup %796  ;;  %v321_v22 = vadd.f32 %v320_v14, %v305_v4  ;;  %v325_v23 = vmul.f32 %v324_v50, %v323_v15  ;;  %v383_v31 = vstv %s1222_s18  ;;  %v428_v32 = vadd.f32 %v427_v25, %v425_v20  ;;  %s1319_s18 = sld [smem:[#allocation7 + $0x19]] }
  0x7c   :  { %v341_v26 = vmul.f32 %v340_v61, %v339_v18  ;;  %v352_v27 = vmul.f32 %v797_v21, %v351_v3  ;;  %v355_v28 = vmul.f32 %v797_v21, %v797_v21  ;;  %804 = vtanh.f32 %v412_v19 }
  0x7d   :  { %v326_v29 = vadd.f32 %v325_v23, %v310_v9  ;;  %v337_v30 = vadd.f32 %v336_v17, %v321_v22  ;;  %v388_v34 = vstv %s1224_s0  ;;  %v440_v35 = vstv %s1229_s1  ;;  %v799_v37 = vpop.eup %798  ;;  %s1323_s0 = sld [smem:[#allocation2 + $0x1e]] }
  0x7e   :  { %v357_v33 = vmul.f32 %v356_v10, %v355_v28  ;;  %v443_v36 = vstv %s1231_s3  ;;  %806 = vtanh.f32 %v428_v32  ;;  %v441_v40 = vmul.f32 %v440_v35, %v990_v0  ;;  %s1325_s1 = sld [smem:[#allocation6 + $0x1e]]  ;;  %s1328_s3 = sld [smem:[#allocation9 + $0x19]] }
  0x7f   :  { %v342_v38 = vadd.f32 %v341_v26, %v326_v29  ;;  %v353_v39 = vadd.f32 %v352_v27, %v337_v30  ;;  %v801_v41 = vpop.eup %800  ;;  %v368_v42 = vmul.f32 %v799_v37, %v367_v11  ;;  %v371_v43 = vmul.f32 %v799_v37, %v799_v37 }
  0x80   :  { %v399_v44 = vstv %s1237_s19  ;;  %v456_v45 = vstv %s1240_s20  ;;  %v384_v47 = vmul.f32 %v801_v41, %v383_v31  ;;  %v387_v48 = vmul.f32 %v801_v41, %v801_v41  ;;  %s1330_s19 = sld [smem:[#allocation7 + $0x1a]] }
  0x81   :  { %v358_v46 = vadd.f32 %v357_v33, %v342_v38  ;;  %v444_v49 = vadd.f32 %v443_v36, %v441_v40  ;;  %v369_v50 = vadd.f32 %v368_v42, %v353_v39  ;;  %v373_v51 = vmul.f32 %v372_v24, %v371_v43  ;;  %s1334_s20 = sld [smem:[#allocation9 + $0x1a]] }
  0x82   :  { %v457_v52 = vmul.f32 %v456_v45, %v990_v0  ;;  %v459_v53 = vstv %s1244_s21  ;;  %v389_v55 = vmul.f32 %v388_v34, %v387_v48  ;;  %v404_v56 = vstv %s1247_s22  ;;  %s1340_s21 = sld [smem:[#allocation2 + $0x1f]] }
  0x83   :  { %v803_v54 = vpop.eup %802  ;;  %v415_v57 = vstv %s1249_s4  ;;  %808 = vtanh.f32 %v444_v49  ;;  %v374_v58 = vadd.f32 %v373_v51, %v358_v46  ;;  %v385_v59 = vadd.f32 %v384_v47, %v369_v50  ;;  %s1342_s22 = sld [smem:[#allocation6 + $0x1f]]  ;;  %s1345_s4 = sld [smem:[#allocation7 + $0x1b]] }
  0x84   :  { %v400_v60 = vmul.f32 %v803_v54, %v399_v44  ;;  %v403_v61 = vmul.f32 %v803_v54, %v803_v54  ;;  %v420_v62 = vstv %s1252_s23  ;;  %v460_v63 = vadd.f32 %v459_v53, %v457_v52  ;;  %s1349_s23 = sld [smem:[#allocation7 + $0x1c]] }
  0x85   :  { %v472_v1 = vstv %s1255_s24  ;;  %v475_v2 = vstv %s1257_s25  ;;  %v390_v4 = vadd.f32 %v389_v55, %v374_v58  ;;  %v431_v10 = vstv %s1262_s26  ;;  %s1353_s24 = sld [smem:[#allocation9 + $0x1b]]  ;;  %s1356_s25 = sld [smem:[#allocation9 + $0x1c]] }
  0x86   :  { %v805_v3 = vpop.eup %804  ;;  %v401_v5 = vadd.f32 %v400_v60, %v385_v59  ;;  %v405_v6 = vmul.f32 %v404_v56, %v403_v61  ;;  %v473_v7 = vmul.f32 %v472_v1, %v990_v0  ;;  %810 = vtanh.f32 %v460_v63  ;;  %s1362_s26 = sld [smem:[#allocation7 + $0x1d]] }
  0x87   :  { %v416_v8 = vmul.f32 %v805_v3, %v415_v57  ;;  %v419_v9 = vmul.f32 %v805_v3, %v805_v3  ;;  %v488_v13 = vstv %s1267_s27  ;;  %v491_v14 = vstv %s1269_s28  ;;  %s1367_s27 = sld [smem:[#allocation9 + $0x1d]]  ;;  %s1369_s28 = sld [smem:[#allocation7 + $0x1e]] }
  0x88   :  { %v406_v11 = vadd.f32 %v405_v6, %v390_v4  ;;  %v476_v12 = vadd.f32 %v475_v2, %v473_v7  ;;  %v807_v15 = vpop.eup %806  ;;  %v436_v18 = vstv %s1271_s29  ;;  %v489_v19 = vmul.f32 %v488_v13, %v990_v0  ;;  %s1374_s29 = sld [smem:[#allocation9 + $0x1e]] }
  0x89   :  { %v417_v16 = vadd.f32 %v416_v8, %v401_v5  ;;  %v421_v17 = vmul.f32 %v420_v62, %v419_v9  ;;  %v432_v20 = vmul.f32 %v807_v15, %v431_v10  ;;  %v435_v21 = vmul.f32 %v807_v15, %v807_v15 }
  0x8a   :  { %v447_v22 = vstv %s1273_s30  ;;  %812 = vtanh.f32 %v476_v12  ;;  %v492_v24 = vadd.f32 %v491_v14, %v489_v19  ;;  %v504_v25 = vstv %s1279_s2  ;;  %s1378_s30 = sld [smem:[#allocation7 + $0x1f]] }
  0x8b   :  { %v422_v23 = vadd.f32 %v421_v17, %v406_v11  ;;  %v507_v26 = vstv %s1281_s7  ;;  %v433_v27 = vadd.f32 %v432_v20, %v417_v16  ;;  %v437_v28 = vmul.f32 %v436_v18, %v435_v21  ;;  %s1381_s2 = sld [smem:[#allocation9 + $0x1f]]  ;;  %s1383_s7 = sld [smem:[#allocation10]] }
  0x8c   :  { %v505_v29 = vmul.f32 %v504_v25, %v990_v0  ;;  %v452_v31 = vstv %s1283_s8  ;;  %814 = vtanh.f32 %v492_v24  ;;  %v520_v32 = vstv %s1288_s9  ;;  %s631_s8 = sld [smem:[#allocation10 + $0x1]]  ;;  %s633_s9 = sld [smem:[#allocation10 + $0x3]] }
  0x8d   :  { %v809_v30 = vpop.eup %808  ;;  %v523_v33 = vstv %s1290_s10  ;;  %v438_v34 = vadd.f32 %v437_v28, %v422_v23  ;;  %v463_v38 = vstv %s1294_s11  ;;  %v521_v39 = vmul.f32 %v520_v32, %v990_v0  ;;  %s632_s10 = sld [smem:[#allocation10 + $0x2]]  ;;  %s925_s11 = smov [#allocation12]  }
  0x8e   :  { %v448_v35 = vmul.f32 %v809_v30, %v447_v22  ;;  %v451_v36 = vmul.f32 %v809_v30, %v809_v30  ;;  %v508_v37 = vadd.f32 %v507_v26, %v505_v29  ;;  %v536_v40 = vstv %s1296_s5  ;;  %s619_s5 = sshll.u32 %s925_s11, 4  ;;  %s620_s5 = int_to_ptr.vmem [resolvable:$true] %s619_s5 }
  0x8f   :  { %v537_v43 = vmul.f32 %v536_v40, %v990_v0  ;;  %v468_v45 = vstv %s1298_s12  ;;  %v479_v46 = vstv %s1303_s13  ;;  %v524_v47 = vadd.f32 %v523_v33, %v521_v39  ;;  %s888_s12 = scalar_lea.vmem %s620_s5, 128  ;;  %p893_p10 = scmp.lt.s32.totalorder %s620_s5, %s620_s5 }
  0x90   :  { %v449_v41 = vadd.f32 %v448_v35, %v433_v27  ;;  %v453_v42 = vmul.f32 %v452_v31, %v451_v36  ;;  %816 = vtanh.f32 %v508_v37  ;;  %v811_v44 = vpop.eup %810  ;;  %v539_v48 = vstv %s1306_s14  ;;  %p889_p9 = scmp.ne.s32.totalorder %s620_s5, %s888_s12  ;;  %p894_p11 = scmp.lt.s32.totalorder %s888_s12, %s888_s12 }
  0x91   :  { %v464_v50 = vmul.f32 %v811_v44, %v463_v38  ;;  %v467_v51 = vmul.f32 %v811_v44, %v811_v44  ;;  %v540_v52 = vadd.f32 %v539_v48, %v537_v43  ;;  %v484_v53 = vstv %s1309_s15 }
  0x92   :  { %v454_v49 = vadd.f32 %v453_v42, %v438_v34  ;;  %818 = vtanh.f32 %v524_v47  ;;  %v552_v54 = vstv %s1313_s16  ;;  %v555_v55 = vstv %s1315_s17  ;;  %p895_p12 = por %p894_p11, %p893_p10 }
  0x93   :  { %v465_v57 = vadd.f32 %v464_v50, %v449_v41  ;;  %v469_v58 = vmul.f32 %v468_v45, %v467_v51  ;;  %820 = vtanh.f32 %v540_v52  ;;  %v553_v59 = vmul.f32 %v552_v54, %v990_v0 }
  0x94   :  { %v813_v56 = vpop.eup %812  ;;  %v495_v62 = vstv %s1319_s18  ;;  %v568_v63 = vstv %s1323_s0  ;;  %v571_v4 = vstv %s1325_s1  ;;  %v500_v8 = vstv %s1328_s3  ;;  %p896_p13 = pnand %p895_p12, %p889_p9 }
  0x95   :  { %v480_v60 = vmul.f32 %v813_v56, %v479_v46  ;;  %v483_v61 = vmul.f32 %v813_v56, %v813_v56  ;;  %v470_v1 = vadd.f32 %v469_v58, %v454_v49  ;;  %v556_v2 = vadd.f32 %v555_v55, %v553_v59 }
  0x96   :  { %v569_v3 = vmul.f32 %v568_v63, %v990_v0  ;;  %v815_v5 = vpop.eup %814  ;;  %v511_v9 = vstv %s1330_s19  ;;  %v516_v14 = vstv %s1334_s20  ;;  %v584_v15 = vstv %s1340_s21 }
  0x97   :  { %v481_v6 = vadd.f32 %v480_v60, %v465_v57  ;;  %v485_v7 = vmul.f32 %v484_v53, %v483_v61  ;;  %v496_v10 = vmul.f32 %v815_v5, %v495_v62  ;;  %v499_v11 = vmul.f32 %v815_v5, %v815_v5 }
  0x98   :  { %822 = vtanh.f32 %v556_v2  ;;  %v572_v12 = vadd.f32 %v571_v4, %v569_v3  ;;  %v587_v16 = vstv %s1342_s22  ;;  %v585_v20 = vmul.f32 %v584_v15, %v990_v0 }
  0x99   :  { %v486_v13 = vadd.f32 %v485_v7, %v470_v1  ;;  %v497_v18 = vadd.f32 %v496_v10, %v481_v6  ;;  %v501_v19 = vmul.f32 %v500_v8, %v499_v11  ;;  %v527_v23 = vstv %s1345_s4 }
  0x9a   :  { %v817_v17 = vpop.eup %816  ;;  %824 = vtanh.f32 %v572_v12  ;;  %v543_v25 = vstv %s1349_s23  ;;  %v588_v26 = vadd.f32 %v587_v16, %v585_v20  ;;  %v532_v30 = vstv %s1353_s24 }
  0x9b   :  { %v512_v21 = vmul.f32 %v817_v17, %v511_v9  ;;  %v515_v22 = vmul.f32 %v817_v17, %v817_v17  ;;  %v502_v24 = vadd.f32 %v501_v19, %v486_v13  ;;  %v548_v34 = vstv %s1356_s25 }
  0x9c   :  { %v819_v27 = vpop.eup %818  ;;  %826 = vtanh.f32 %v588_v26  ;;  %v559_v39 = vstv %s1362_s26  ;;  %v564_v44 = vstv %s1367_s27  ;;  %v575_v45 = vstv %s1369_s28 }
  0x9d   :  { %v513_v28 = vadd.f32 %v512_v21, %v497_v18  ;;  %v517_v29 = vmul.f32 %v516_v14, %v515_v22  ;;  %v821_v31 = vpop.eup %820  ;;  %v528_v32 = vmul.f32 %v819_v27, %v527_v23  ;;  %v531_v33 = vmul.f32 %v819_v27, %v819_v27 }
  0x9e   :  { %v544_v35 = vmul.f32 %v821_v31, %v543_v25  ;;  %v547_v36 = vmul.f32 %v821_v31, %v821_v31  ;;  %v580_v50 = vstv %s1374_s29  ;;  %v591_v55 = vstv %s1378_s30 }
  0x9f   :  { %v518_v0 = vadd.f32 %v517_v29, %v502_v24  ;;  %v529_v37 = vadd.f32 %v528_v32, %v513_v28  ;;  %v533_v38 = vmul.f32 %v532_v30, %v531_v33  ;;  %v596_v60 = vstv %s1381_s2 }
  0xa0   :  { %v549_v40 = vmul.f32 %v548_v34, %v547_v36  ;;  %v603_v1 = vstv %s1383_s7  ;;  %v599_v4 = vstv %s633_s9  ;;  %v605_v5 = vstv %s631_s8 }
  0xa1   :  { %v534_v42 = vadd.f32 %v533_v38, %v518_v0  ;;  %v545_v43 = vadd.f32 %v544_v35, %v529_v37  ;;  %v607_v8 = vstv %s632_s10 }
  0xa2   :  { %v823_v41 = vpop.eup %822 }
  0xa3   :  { %v560_v46 = vmul.f32 %v823_v41, %v559_v39  ;;  %v563_v47 = vmul.f32 %v823_v41, %v823_v41  ;;  %v550_v49 = vadd.f32 %v549_v40, %v534_v42 }
  0xa4   :  { %v825_v48 = vpop.eup %824 }
  0xa5   :  { %v561_v51 = vadd.f32 %v560_v46, %v545_v43  ;;  %v565_v52 = vmul.f32 %v564_v44, %v563_v47  ;;  %v576_v53 = vmul.f32 %v825_v48, %v575_v45  ;;  %v579_v54 = vmul.f32 %v825_v48, %v825_v48 }
  0xa6   :  { %v827_v59 = vpop.eup %826 }
  0xa7   :  { %v566_v56 = vadd.f32 %v565_v52, %v550_v49  ;;  %v577_v57 = vadd.f32 %v576_v53, %v561_v51  ;;  %v581_v58 = vmul.f32 %v580_v50, %v579_v54  ;;  %v592_v62 = vmul.f32 %v827_v59, %v591_v55 }
  0xa8   :  { %v595_v63 = vmul.f32 %v827_v59, %v827_v59 }
  0xa9   :  { %v582_v61 = vadd.f32 %v581_v58, %v566_v56  ;;  %v593_v2 = vadd.f32 %v592_v62, %v577_v57 }
  0xaa   :  { %v597_v3 = vmul.f32 %v596_v60, %v595_v63 }
  0xab   :  { %v604_v7 = vadd.f32 %v603_v1, %v593_v2 }
  0xac   :  { %v598_v6 = vadd.f32 %v597_v3, %v582_v61 }
  0xad   :  { %v606_v10 = vmul.f32 %v605_v5, %v604_v7 }
  0xae   :  { %v600_v9 = vsub.f32 %v599_v4, %v598_v6 }
  0xaf   :  { %v608_v12 = vadd.f32 %v607_v8, %v606_v10 }
  0xb0   :  { %v601_v11 = vmul.f32 %v600_v9, %v600_v9 }
  0xb2   :  { %v602_v13 = vadd.f32 1.0, %v601_v11 }
  0xb4   :  { %v609_v14 = vmul.f32 %v608_v12, %v602_v13 }
  0xb6   :  { %828 = vrsqrt.f32 %v609_v14 }
  0xc0   :  { %v829_v15 = vpop.eup %828 }
  0xc1   :  { %v611_v16 = vmul.f32 %v829_v15, %v602_v13 }
  0xc3   :  { %612 = vst [vmem:[#allocation12] sm:$0xff] %v611_v16 }
  0xc4   :  { %899 = shalt.err (!%p896_p13)
}
  0xc5   :  { %s900_s15 = scalar_lea.hbm %s1409_s6, 128 }
  0xc6   :  { %p901_p0 = scmp.ne.s32.totalorder %s1409_s6, %s900_s15  ;;  %p904_p1 = scmp.lt.u32.totalorder %s900_s15, %s1409_s6 }
  0xc8   :  { %p906_p2 = pnand %p904_p1, %p901_p0 }
  0xca   :  { %909 = shalt.err (!%p906_p2)
}
  0xcb   :  { %622 = dma.vmem_to_hbm [thread:$0]  %s620_s5, 128, %s1409_s6, [#allocation3]  }
  0xcc   :  { %918 = dma.done.wait [#allocation3], 128  }
  0xcd   :  { %919 = vsyncadd [#allocation3], 4294967168 }
  0xce   :  { %626 = vsyncpa [#allocation3], 1 }
  0xcf   :  { %627 = vsyncpa [#allocation4], 1 }
  0xd0   :  { %628 = vsyncpa [#allocation5], 1 }
  0xd1   :  { %629 = vsyncpa [#allocation8], 1 }
  0xd2   :  { %630 = vsyncpa [#allocation11], 1 }

</bundles_post_ra>
